<compile_context>
chip_gen: v7x
topology: tpu7x:2x2x1
jax: 0.10.0
libtpu: 0.0.40
codegen_flags: <defaults>
</compile_context>

<pallas_src>
import functools

import jax
import jax.numpy as jnp
from jax.experimental import pallas as pl
from jax.experimental.pallas import tpu as pltpu

_BN_EPS = 1e-5


def _pick_vmem_limit():
    # ~3/4 of physical VMEM, capped at 100 MiB: 96 MiB on v5e/v6e (128 MiB
    # physical), 48 MiB on v7x (64 MiB physical).  Conservative fallback.
    try:
        info = pltpu.get_tpu_info()
        phys = getattr(info, "vmem_capacity_bytes", None)
        if phys:
            return int(min(phys * 3 // 4, 100 * 1024 * 1024))
    except Exception:
        pass
    return 32 * 1024 * 1024


_CP = pltpu.CompilerParams(
    dimension_semantics=("arbitrary",),
    vmem_limit_bytes=_pick_vmem_limit(),
)


def _full_spec(shape):
    nd = len(shape)
    return pl.BlockSpec(shape, lambda i: (0,) * nd)


# ---------------------------- Pallas kernels ----------------------------

def _conv_bn_relu_kernel(p_ref, w_ref, g_ref, b_ref, o_ref, *, eps):
    # Lane-dense conv GEMM: (Cout, M) = W(Cout, K) @ patches(K, M), f32 acc.
    y = jnp.dot(w_ref[...], p_ref[...], preferred_element_type=jnp.float32)
    # One-pass training-mode BatchNorm (biased variance, like torch train BN)
    # with the affine folded into a single scale/shift per channel.
    inv_m = 1.0 / y.shape[1]
    mean = jnp.sum(y, axis=1, keepdims=True) * inv_m
    ex2 = jnp.sum(y * y, axis=1, keepdims=True) * inv_m
    scale = g_ref[...] * jax.lax.rsqrt(ex2 - mean * mean + eps)
    shift = b_ref[...] - mean * scale
    o_ref[...] = jnp.maximum(y * scale + shift, 0.0).astype(o_ref.dtype)


def _tail_kernel(p_ref, wc_ref, g_ref, b_ref,
                 w1_ref, b1_ref, w2_ref, b2_ref, w3_ref, b3_ref,
                 o_ref, x_scr, *, batch, eps):
    # conv2 + BN2 + ReLU + MaxPool(2,2) + NCHW flatten + 3-layer MLP, fused.
    m = p_ref.shape[1]          # 4 * B * 49   (pool-window-major column order)
    bq = m // 4                 # B * 49

    # conv2, lane-dense: (5, M)
    y = jnp.dot(wc_ref[...], p_ref[...], preferred_element_type=jnp.float32)

    # one-pass folded BatchNorm (training-mode batch stats) + ReLU
    inv_m = 1.0 / m
    mean = jnp.sum(y, axis=1, keepdims=True) * inv_m
    ex2 = jnp.sum(y * y, axis=1, keepdims=True) * inv_m
    scale = g_ref[...] * jax.lax.rsqrt(ex2 - mean * mean + eps)
    shift = b_ref[...] - mean * scale
    y = jnp.maximum(y * scale + shift, 0.0)

    # Fused MaxPool(2,2): columns are ordered (pool_dh, pool_dw, b, ph, pw),
    # so the pool is an element-wise max of four contiguous lane blocks.
    pooled = jnp.maximum(jnp.maximum(y[:, 0 * bq:1 * bq], y[:, 1 * bq:2 * bq]),
                         jnp.maximum(y[:, 2 * bq:3 * bq], y[:, 3 * bq:4 * bq]))

    # Flatten to PyTorch (c, h, w) feature order into a (B, 256) VMEM scratch
    # (FC1 contraction zero-padded 245 -> 256).  Static tiny copies instead of
    # an in-kernel reshape/transpose.  batch is static; 5*B unrolled stores.
    x_scr[...] = jnp.zeros_like(x_scr)
    for b in range(batch):
        for c in range(5):
            x_scr[b:b + 1, c * 49:(c + 1) * 49] = (
                pooled[c:c + 1, b * 49:(b + 1) * 49].astype(x_scr.dtype))

    # Fused MLP: Linear(256->1024)+ReLU -> Linear(1024->128)+ReLU -> Linear(128->10)
    h = jnp.dot(x_scr[...], w1_ref[...], preferred_element_type=jnp.float32)
    h = jnp.maximum(h + b1_ref[...], 0.0).astype(jnp.bfloat16)
    h = jnp.dot(h, w2_ref[...], preferred_element_type=jnp.float32)
    h = jnp.maximum(h + b2_ref[...], 0.0).astype(jnp.bfloat16)
    o_ref[...] = (jnp.dot(h, w3_ref[...], preferred_element_type=jnp.float32)
                  + b3_ref[...]).astype(o_ref.dtype)


# ------------------------- pallas_call wrappers -------------------------

def conv_bn_relu(patches, w, gamma, beta):
    K, M = patches.shape
    C = w.shape[0]
    cost = pl.CostEstimate(
        flops=2 * C * K * M + 6 * C * M,
        transcendentals=C,
        bytes_accessed=2 * (K * M + C * K + C * M) + 8 * C,
    )
    return pl.pallas_call(
        functools.partial(_conv_bn_relu_kernel, eps=_BN_EPS),
        out_shape=jax.ShapeDtypeStruct((C, M), jnp.bfloat16),
        grid=(1,),
        in_specs=[_full_spec((K, M)), _full_spec((C, K)),
                  _full_spec((C, 1)), _full_spec((C, 1))],
        out_specs=_full_spec((C, M)),
        compiler_params=_CP,
        cost_estimate=cost,
    )(patches, w, gamma, beta)


def conv2_pool_mlp(p2, params, batch):
    K, M = p2.shape  # (250, 4*B*49)
    fc_flops = 2 * batch * (256 * 1024 + 1024 * 128 + 128 * 10)
    cost = pl.CostEstimate(
        flops=2 * 5 * K * M + 10 * 5 * M + fc_flops,
        transcendentals=5,
        bytes_accessed=(2 * (K * M + 5 * K + 256 * 1024 + 1024 * 128 + 128 * 10)
                        + 4 * (1024 + 128 + 10 + 10) + 4 * batch * 10),
    )
    return pl.pallas_call(
        functools.partial(_tail_kernel, batch=batch, eps=_BN_EPS),
        out_shape=jax.ShapeDtypeStruct((batch, 10), jnp.float32),
        grid=(1,),
        in_specs=[_full_spec(p2.shape),
                  _full_spec(params["conv2_w"].shape),
                  _full_spec(params["bn2_g"].shape),
                  _full_spec(params["bn2_b"].shape),
                  _full_spec(params["fc1_w"].shape),
                  _full_spec(params["fc1_b"].shape),
                  _full_spec(params["fc2_w"].shape),
                  _full_spec(params["fc2_b"].shape),
                  _full_spec(params["fc3_w"].shape),
                  _full_spec(params["fc3_b"].shape)],
        out_specs=_full_spec((batch, 10)),
        scratch_shapes=[pltpu.VMEM((batch, 256), jnp.bfloat16)],
        compiler_params=_CP,
        cost_estimate=cost,
    )(p2, params["conv2_w"], params["bn2_g"], params["bn2_b"],
      params["fc1_w"], params["fc1_b"], params["fc2_w"], params["fc2_b"],
      params["fc3_w"], params["fc3_b"])


# ----------------------------- XLA glue ------------------------------

def _conv1_patches(x, k, pad):
    # x: (B, 28, 28) f32 -> im2col patches, lane-dense (K=9, M=B*30*30).
    # Rows ordered (dh, dw) to match the conv1 weight; columns (b, oh, ow).
    B, H, W = x.shape
    xp = jnp.pad(x, ((0, 0), (pad, pad), (pad, pad)))
    oh = H + 2 * pad - k + 1
    ow = W + 2 * pad - k + 1
    taps = [xp[:, dh:dh + oh, dw:dw + ow]
            for dh in range(k) for dw in range(k)]
    return jnp.stack(taps, axis=0).reshape(k * k, B * oh * ow)


def _maxpool_hw(x, k, s):
    # Element-wise max over the k*k strided window views of the trailing
    # (H, W) dims; XLA fuses this into one pass (floor mode, like torch).
    h, w = x.shape[-2], x.shape[-1]
    oh = (h - k) // s + 1
    ow = (w - k) // s + 1
    out = None
    for dh in range(k):
        for dw in range(k):
            win = x[..., dh:dh + (oh - 1) * s + 1:s, dw:dw + (ow - 1) * s + 1:s]
            out = win if out is None else jnp.maximum(out, win)
    return out


def _conv2_patches_pool_major(p1, k, pad):
    # p1: (10, B, 14, 14) pooled conv1 activation (channel-major, lane-dense).
    # Builds the conv2 im2col matrix (K=250, M=4*B*49) with rows (cin, dh, dw)
    # and columns ordered (pool_dh, pool_dw, b, ph, pw) so the 2x2 pool becomes
    # a max of four contiguous lane blocks inside the fused tail kernel.
    C, B, H, W = p1.shape
    xp = jnp.pad(p1, ((0, 0), (0, 0), (pad, pad), (pad, pad)))
    taps = [xp[:, :, dh:dh + H, dw:dw + W]
            for dh in range(k) for dw in range(k)]
    pat = jnp.stack(taps, axis=1)                           # (C, 25, B, 14, 14)
    pat = pat.reshape(C, k * k, B, H // 2, 2, W // 2, 2)     # oh->(ph,dh'), ow->(pw,dw')
    pat = jnp.transpose(pat, (0, 1, 4, 6, 2, 3, 5))          # (C, 25, dh', dw', B, 7, 7)
    return pat.reshape(C * k * k, 4 * B * (H // 2) * (W // 2))


# ------------------- deterministic parameter init -------------------

def init_params(key):
    # Kernel-ready layouts prepared ONCE outside the jitted forward:
    #   conv weights as (Cout, K) bf16 with K ordered (cin, kh, kw);
    #   FC weights as (in, out) bf16, FC1 zero-padded 245 -> 256 rows;
    #   BN affine as (C, 1) f32 columns.
    # Init mirrors PyTorch defaults: U(-1/sqrt(fan_in), 1/sqrt(fan_in)).
    # Conv biases are not materialised: training-mode BatchNorm (batch stats)
    # cancels a per-channel conv bias exactly (NOT valid for eval-mode BN).
    ks = jax.random.split(key, 8)

    def u(k_, shape, fan_in):
        bound = 1.0 / jnp.sqrt(float(fan_in))
        return jax.random.uniform(k_, shape, jnp.float32, -bound, bound)

    p = {}
    w1 = u(ks[0], (10, 1, 3, 3), 1 * 3 * 3)
    p["conv1_w"] = w1.reshape(10, 9).astype(jnp.bfloat16)
    p["bn1_g"] = jnp.ones((10, 1), jnp.float32)
    p["bn1_b"] = jnp.zeros((10, 1), jnp.float32)

    w2 = u(ks[1], (5, 10, 5, 5), 10 * 5 * 5)
    p["conv2_w"] = w2.reshape(5, 250).astype(jnp.bfloat16)
    p["bn2_g"] = jnp.ones((5, 1), jnp.float32)
    p["bn2_b"] = jnp.zeros((5, 1), jnp.float32)

    fc1 = u(ks[2], (1024, 245), 245).T                                  # (245, 1024)
    p["fc1_w"] = jnp.pad(fc1, ((0, 11), (0, 0))).astype(jnp.bfloat16)   # (256, 1024)
    p["fc1_b"] = u(ks[3], (1, 1024), 245)
    p["fc2_w"] = u(ks[4], (128, 1024), 1024).T.astype(jnp.bfloat16)
    p["fc2_b"] = u(ks[5], (1, 128), 1024)
    p["fc3_w"] = u(ks[6], (10, 128), 128).T.astype(jnp.bfloat16)
    p["fc3_b"] = u(ks[7], (1, 10), 128)
    return p


# ------------------------------ forward ------------------------------

def minist_net_forward(params, x_nchw):
    B = x_nchw.shape[0]
    x = x_nchw[:, 0, :, :].astype(jnp.float32)                 # (B, 28, 28), Cin = 1

    # layer1 block A: Conv(1->10, k3, p2) + BN + ReLU, fused & lane-dense.
    p1 = _conv1_patches(x, k=3, pad=2).astype(jnp.bfloat16)    # (9, B*900)
    y1 = conv_bn_relu(p1, params["conv1_w"],
                      params["bn1_g"], params["bn1_b"])        # (10, B*900) bf16
    # MaxPool(3, 2) stays in XLA glue (overlapping windows, single fused pass).
    # TODO(synk): fold into the conv kernel via pool-window-replicated columns
    # (as done for conv2) if this ever shows up in profiles.
    pooled1 = _maxpool_hw(y1.reshape(10, B, 30, 30), k=3, s=2)  # (10, B, 14, 14)

    # layer1 block B + layer2, ONE fused kernel:
    # conv2 + BN2 + ReLU + MaxPool(2,2) + NCHW flatten + FC1/ReLU/FC2/ReLU/FC3.
    p2 = _conv2_patches_pool_major(pooled1, k=5, pad=2)        # (250, 4*B*49) bf16
    return conv2_pool_mlp(p2, params, batch=B)                  # (B, 10) f32


if __name__ == "__main__":
    key = jax.random.PRNGKey(0)
    pkey, xkey = jax.random.split(key)
    params = init_params(pkey)
    x = jax.random.normal(xkey, (2, 1, 28, 28), jnp.float32)    # NCHW, MNIST-sized
    fwd = jax.jit(minist_net_forward)
    out = fwd(params, x)
    jax.block_until_ready(out)
    assert out.shape == (2, 10) and out.dtype == jnp.float32
    print("KERNEL_OK")
</pallas_src>

<mosaic_0001>
module attributes {stable_mosaic.version = 11 : i64} {
  func.func @_conv_bn_relu_kernel(%arg0: i32, %arg1: memref<9x1800xbf16, #tpu.memory_space<vmem>>, %arg2: memref<10x9xbf16, #tpu.memory_space<vmem>>, %arg3: memref<10x1xf32, #tpu.memory_space<vmem>>, %arg4: memref<10x1xf32, #tpu.memory_space<vmem>>, %arg5: memref<10x1800xbf16, #tpu.memory_space<vmem>>) attributes {dimension_semantics = [#tpu.dimension_semantics<arbitrary>], iteration_bounds = array<i64: 1>, scalar_prefetch = 0 : i64, scratch_operands = 0 : i64, tpu.core_type = #tpu.core_type<tc>, window_params = [{pipeline_mode = #tpu.pipeline_mode<synchronous>, transform_indices = @transform_0, window_bounds = array<i64: 9, 1800>}, {pipeline_mode = #tpu.pipeline_mode<synchronous>, transform_indices = @transform_1, window_bounds = array<i64: 10, 9>}, {pipeline_mode = #tpu.pipeline_mode<synchronous>, transform_indices = @transform_2, window_bounds = array<i64: 10, 1>}, {pipeline_mode = #tpu.pipeline_mode<synchronous>, transform_indices = @transform_3, window_bounds = array<i64: 10, 1>}, {pipeline_mode = #tpu.pipeline_mode<synchronous>, transform_indices = @transform_4, window_bounds = array<i64: 10, 1800>}]} {
    %c0 = arith.constant 0 : index
    %c0_0 = arith.constant 0 : index
    %0 = vector.load %arg2[%c0, %c0_0] : memref<10x9xbf16, #tpu.memory_space<vmem>>, vector<10x9xbf16>
    %c0_1 = arith.constant 0 : index
    %c0_2 = arith.constant 0 : index
    %1 = vector.load %arg1[%c0_1, %c0_2] : memref<9x1800xbf16, #tpu.memory_space<vmem>>, vector<9x1800xbf16>
    %cst = arith.constant dense<0.000000e+00> : vector<10x1800xf32>
    %2 = tpu.matmul %0, %1, %cst {dimension_numbers = #tpu.dot_dimension_numbers<[1], [0], [0], [1], [0, 0, 1, 1], [], []>} : vector<10x9xbf16>, vector<9x1800xbf16>, vector<10x1800xf32> -> vector<10x1800xf32>
    %cst_3 = arith.constant dense<0.000000e+00> : vector<10xf32>
    %3 = vector.multi_reduction <add>, %2, %cst_3 [1] : vector<10x1800xf32> to vector<10xf32>
    %4 = vector.shape_cast %3 : vector<10xf32> to vector<10x1xf32>
    %cst_4 = arith.constant 5.55555569E-4 : f32
    %5 = vector.broadcast %cst_4 : f32 to vector<10x1xf32>
    %6 = arith.mulf %4, %5 : vector<10x1xf32>
    %7 = arith.mulf %2, %2 : vector<10x1800xf32>
    %cst_5 = arith.constant dense<0.000000e+00> : vector<10xf32>
    %8 = vector.multi_reduction <add>, %7, %cst_5 [1] : vector<10x1800xf32> to vector<10xf32>
    %9 = vector.shape_cast %8 : vector<10xf32> to vector<10x1xf32>
    %cst_6 = arith.constant 5.55555569E-4 : f32
    %10 = vector.broadcast %cst_6 : f32 to vector<10x1xf32>
    %11 = arith.mulf %9, %10 : vector<10x1xf32>
    %c0_7 = arith.constant 0 : index
    %c0_8 = arith.constant 0 : index
    %12 = vector.load %arg3[%c0_7, %c0_8] : memref<10x1xf32, #tpu.memory_space<vmem>>, vector<10x1xf32>
    %13 = arith.mulf %6, %6 : vector<10x1xf32>
    %14 = arith.subf %11, %13 : vector<10x1xf32>
    %cst_9 = arith.constant 9.99999974E-6 : f32
    %15 = vector.broadcast %cst_9 : f32 to vector<10x1xf32>
    %16 = arith.addf %14, %15 : vector<10x1xf32>
    %17 = math.rsqrt %16 : vector<10x1xf32>
    %18 = arith.mulf %12, %17 : vector<10x1xf32>
    %c0_10 = arith.constant 0 : index
    %c0_11 = arith.constant 0 : index
    %19 = vector.load %arg4[%c0_10, %c0_11] : memref<10x1xf32, #tpu.memory_space<vmem>>, vector<10x1xf32>
    %20 = arith.mulf %6, %18 : vector<10x1xf32>
    %21 = arith.subf %19, %20 : vector<10x1xf32>
    %22 = vector.broadcast %18 : vector<10x1xf32> to vector<10x1800xf32>
    %23 = arith.mulf %2, %22 : vector<10x1800xf32>
    %24 = vector.broadcast %21 : vector<10x1xf32> to vector<10x1800xf32>
    %25 = arith.addf %23, %24 : vector<10x1800xf32>
    %cst_12 = arith.constant 0.000000e+00 : f32
    %26 = vector.broadcast %cst_12 : f32 to vector<10x1800xf32>
    %27 = arith.maximumf %25, %26 : vector<10x1800xf32>
    %28 = arith.truncf %27 : vector<10x1800xf32> to vector<10x1800xbf16>
    %c0_13 = arith.constant 0 : index
    %c0_14 = arith.constant 0 : index
    %29 = vector.load %arg5[%c0_13, %c0_14] : memref<10x1800xbf16, #tpu.memory_space<vmem>>, vector<10x1800xbf16>
    tpu.vector_store %arg5[%c0_13, %c0_14], %28 {strides = array<i32>} : memref<10x1800xbf16, #tpu.memory_space<vmem>>, vector<10x1800xbf16>,
    return
  }
  func.func @transform_0(%arg0: i32) -> (i32, i32) {
    %c0_i32 = arith.constant 0 : i32
    %c0_i32_0 = arith.constant 0 : i32
    %c0_i32_1 = arith.constant 0 : i32
    return %c0_i32, %c0_i32_0 : i32, i32
  }
  func.func @transform_1(%arg0: i32) -> (i32, i32) {
    %c0_i32 = arith.constant 0 : i32
    %c0_i32_0 = arith.constant 0 : i32
    %c0_i32_1 = arith.constant 0 : i32
    return %c0_i32, %c0_i32_0 : i32, i32
  }
  func.func @transform_2(%arg0: i32) -> (i32, i32) {
    %c0_i32 = arith.constant 0 : i32
    %c0_i32_0 = arith.constant 0 : i32
    %c0_i32_1 = arith.constant 0 : i32
    return %c0_i32, %c0_i32_0 : i32, i32
  }
  func.func @transform_3(%arg0: i32) -> (i32, i32) {
    %c0_i32 = arith.constant 0 : i32
    %c0_i32_0 = arith.constant 0 : i32
    %c0_i32_1 = arith.constant 0 : i32
    return %c0_i32, %c0_i32_0 : i32, i32
  }
  func.func @transform_4(%arg0: i32) -> (i32, i32) {
    %c0_i32 = arith.constant 0 : i32
    %c0_i32_0 = arith.constant 0 : i32
    %c0_i32_1 = arith.constant 0 : i32
    return %c0_i32, %c0_i32_0 : i32, i32
  }
}

module attributes {stable_mosaic.version = 11 : i64} {
  func.func @_tail_kernel(%arg0: i32, %arg1: memref<250x392xbf16, #tpu.memory_space<vmem>>, %arg2: memref<5x250xbf16, #tpu.memory_space<vmem>>, %arg3: memref<5x1xf32, #tpu.memory_space<vmem>>, %arg4: memref<5x1xf32, #tpu.memory_space<vmem>>, %arg5: memref<256x1024xbf16, #tpu.memory_space<vmem>>, %arg6: memref<1x1024xf32, #tpu.memory_space<vmem>>, %arg7: memref<1024x128xbf16, #tpu.memory_space<vmem>>, %arg8: memref<1x128xf32, #tpu.memory_space<vmem>>, %arg9: memref<128x10xbf16, #tpu.memory_space<vmem>>, %arg10: memref<1x10xf32, #tpu.memory_space<vmem>>, %arg11: memref<2x10xf32, #tpu.memory_space<vmem>>, %arg12: memref<2x256xbf16, #tpu.memory_space<vmem>>) attributes {dimension_semantics = [#tpu.dimension_semantics<arbitrary>], iteration_bounds = array<i64: 1>, scalar_prefetch = 0 : i64, scratch_operands = 1 : i64, tpu.core_type = #tpu.core_type<tc>, window_params = [{pipeline_mode = #tpu.pipeline_mode<synchronous>, transform_indices = @transform_0, window_bounds = array<i64: 250, 392>}, {pipeline_mode = #tpu.pipeline_mode<synchronous>, transform_indices = @transform_1, window_bounds = array<i64: 5, 250>}, {pipeline_mode = #tpu.pipeline_mode<synchronous>, transform_indices = @transform_2, window_bounds = array<i64: 5, 1>}, {pipeline_mode = #tpu.pipeline_mode<synchronous>, transform_indices = @transform_3, window_bounds = array<i64: 5, 1>}, {pipeline_mode = #tpu.pipeline_mode<synchronous>, transform_indices = @transform_4, window_bounds = array<i64: 256, 1024>}, {pipeline_mode = #tpu.pipeline_mode<synchronous>, transform_indices = @transform_5, window_bounds = array<i64: 1, 1024>}, {pipeline_mode = #tpu.pipeline_mode<synchronous>, transform_indices = @transform_6, window_bounds = array<i64: 1024, 128>}, {pipeline_mode = #tpu.pipeline_mode<synchronous>, transform_indices = @transform_7, window_bounds = array<i64: 1, 128>}, {pipeline_mode = #tpu.pipeline_mode<synchronous>, transform_indices = @transform_8, window_bounds = array<i64: 128, 10>}, {pipeline_mode = #tpu.pipeline_mode<synchronous>, transform_indices = @transform_9, window_bounds = array<i64: 1, 10>}, {pipeline_mode = #tpu.pipeline_mode<synchronous>, transform_indices = @transform_10, window_bounds = array<i64: 2, 10>}]} {
    %c0 = arith.constant 0 : index
    %c0_0 = arith.constant 0 : index
    %0 = vector.load %arg2[%c0, %c0_0] : memref<5x250xbf16, #tpu.memory_space<vmem>>, vector<5x250xbf16>
    %c0_1 = arith.constant 0 : index
    %c0_2 = arith.constant 0 : index
    %1 = vector.load %arg1[%c0_1, %c0_2] : memref<250x392xbf16, #tpu.memory_space<vmem>>, vector<250x392xbf16>
    %cst = arith.constant dense<0.000000e+00> : vector<5x392xf32>
    %2 = tpu.matmul %0, %1, %cst {dimension_numbers = #tpu.dot_dimension_numbers<[1], [0], [0], [1], [0, 0, 1, 1], [], []>} : vector<5x250xbf16>, vector<250x392xbf16>, vector<5x392xf32> -> vector<5x392xf32>
    %cst_3 = arith.constant dense<0.000000e+00> : vector<5xf32>
    %3 = vector.multi_reduction <add>, %2, %cst_3 [1] : vector<5x392xf32> to vector<5xf32>
    %4 = vector.shape_cast %3 : vector<5xf32> to vector<5x1xf32>
    %cst_4 = arith.constant 0.00255102036 : f32
    %5 = vector.broadcast %cst_4 : f32 to vector<5x1xf32>
    %6 = arith.mulf %4, %5 : vector<5x1xf32>
    %7 = arith.mulf %2, %2 : vector<5x392xf32>
    %cst_5 = arith.constant dense<0.000000e+00> : vector<5xf32>
    %8 = vector.multi_reduction <add>, %7, %cst_5 [1] : vector<5x392xf32> to vector<5xf32>
    %9 = vector.shape_cast %8 : vector<5xf32> to vector<5x1xf32>
    %cst_6 = arith.constant 0.00255102036 : f32
    %10 = vector.broadcast %cst_6 : f32 to vector<5x1xf32>
    %11 = arith.mulf %9, %10 : vector<5x1xf32>
    %c0_7 = arith.constant 0 : index
    %c0_8 = arith.constant 0 : index
    %12 = vector.load %arg3[%c0_7, %c0_8] : memref<5x1xf32, #tpu.memory_space<vmem>>, vector<5x1xf32>
    %13 = arith.mulf %6, %6 : vector<5x1xf32>
    %14 = arith.subf %11, %13 : vector<5x1xf32>
    %cst_9 = arith.constant 9.99999974E-6 : f32
    %15 = vector.broadcast %cst_9 : f32 to vector<5x1xf32>
    %16 = arith.addf %14, %15 : vector<5x1xf32>
    %17 = math.rsqrt %16 : vector<5x1xf32>
    %18 = arith.mulf %12, %17 : vector<5x1xf32>
    %c0_10 = arith.constant 0 : index
    %c0_11 = arith.constant 0 : index
    %19 = vector.load %arg4[%c0_10, %c0_11] : memref<5x1xf32, #tpu.memory_space<vmem>>, vector<5x1xf32>
    %20 = arith.mulf %6, %18 : vector<5x1xf32>
    %21 = arith.subf %19, %20 : vector<5x1xf32>
    %22 = vector.broadcast %18 : vector<5x1xf32> to vector<5x392xf32>
    %23 = arith.mulf %2, %22 : vector<5x392xf32>
    %24 = vector.broadcast %21 : vector<5x1xf32> to vector<5x392xf32>
    %25 = arith.addf %23, %24 : vector<5x392xf32>
    %cst_12 = arith.constant 0.000000e+00 : f32
    %26 = vector.broadcast %cst_12 : f32 to vector<5x392xf32>
    %27 = arith.maximumf %25, %26 : vector<5x392xf32>
    %28 = vector.extract_strided_slice %27 {offsets = [0, 0], sizes = [5, 98], strides = [1, 1]} : vector<5x392xf32> to vector<5x98xf32>
    %29 = vector.extract_strided_slice %27 {offsets = [0, 98], sizes = [5, 98], strides = [1, 1]} : vector<5x392xf32> to vector<5x98xf32>
    %30 = arith.maximumf %28, %29 : vector<5x98xf32>
    %31 = vector.extract_strided_slice %27 {offsets = [0, 196], sizes = [5, 98], strides = [1, 1]} : vector<5x392xf32> to vector<5x98xf32>
    %32 = vector.extract_strided_slice %27 {offsets = [0, 294], sizes = [5, 98], strides = [1, 1]} : vector<5x392xf32> to vector<5x98xf32>
    %33 = arith.maximumf %31, %32 : vector<5x98xf32>
    %34 = arith.maximumf %30, %33 : vector<5x98xf32>
    %cst_13 = arith.constant 0.000000e+00 : bf16
    %35 = vector.broadcast %cst_13 : bf16 to vector<2x256xbf16>
    %c0_14 = arith.constant 0 : index
    %c0_15 = arith.constant 0 : index
    %36 = vector.load %arg12[%c0_14, %c0_15] : memref<2x256xbf16, #tpu.memory_space<vmem>>, vector<2x256xbf16>
    tpu.vector_store %arg12[%c0_14, %c0_15], %35 {strides = array<i32>} : memref<2x256xbf16, #tpu.memory_space<vmem>>, vector<2x256xbf16>,
    %37 = vector.extract_strided_slice %34 {offsets = [0, 0], sizes = [1, 49], strides = [1, 1]} : vector<5x98xf32> to vector<1x49xf32>
    %38 = arith.truncf %37 : vector<1x49xf32> to vector<1x49xbf16>
    %c0_16 = arith.constant 0 : index
    %c0_17 = arith.constant 0 : index
    %39 = vector.load %arg12[%c0_16, %c0_17] : memref<2x256xbf16, #tpu.memory_space<vmem>>, vector<1x49xbf16>
    tpu.vector_store %arg12[%c0_16, %c0_17], %38 {strides = array<i32>} : memref<2x256xbf16, #tpu.memory_space<vmem>>, vector<1x49xbf16>,
    %40 = vector.extract_strided_slice %34 {offsets = [1, 0], sizes = [1, 49], strides = [1, 1]} : vector<5x98xf32> to vector<1x49xf32>
    %41 = arith.truncf %40 : vector<1x49xf32> to vector<1x49xbf16>
    %c0_18 = arith.constant 0 : index
    %c49 = arith.constant 49 : index
    %42 = vector.load %arg12[%c0_18, %c49] : memref<2x256xbf16, #tpu.memory_space<vmem>>, vector<1x49xbf16>
    tpu.vector_store %arg12[%c0_18, %c49], %41 {strides = array<i32>} : memref<2x256xbf16, #tpu.memory_space<vmem>>, vector<1x49xbf16>,
    %43 = vector.extract_strided_slice %34 {offsets = [2, 0], sizes = [1, 49], strides = [1, 1]} : vector<5x98xf32> to vector<1x49xf32>
    %44 = arith.truncf %43 : vector<1x49xf32> to vector<1x49xbf16>
    %c0_19 = arith.constant 0 : index
    %c98 = arith.constant 98 : index
    %45 = vector.load %arg12[%c0_19, %c98] : memref<2x256xbf16, #tpu.memory_space<vmem>>, vector<1x49xbf16>
    tpu.vector_store %arg12[%c0_19, %c98], %44 {strides = array<i32>} : memref<2x256xbf16, #tpu.memory_space<vmem>>, vector<1x49xbf16>,
    %46 = vector.extract_strided_slice %34 {offsets = [3, 0], sizes = [1, 49], strides = [1, 1]} : vector<5x98xf32> to vector<1x49xf32>
    %47 = arith.truncf %46 : vector<1x49xf32> to vector<1x49xbf16>
    %c0_20 = arith.constant 0 : index
    %c147 = arith.constant 147 : index
    %48 = vector.load %arg12[%c0_20, %c147] : memref<2x256xbf16, #tpu.memory_space<vmem>>, vector<1x49xbf16>
    tpu.vector_store %arg12[%c0_20, %c147], %47 {strides = array<i32>} : memref<2x256xbf16, #tpu.memory_space<vmem>>, vector<1x49xbf16>,
    %49 = vector.extract_strided_slice %34 {offsets = [4, 0], sizes = [1, 49], strides = [1, 1]} : vector<5x98xf32> to vector<1x49xf32>
    %50 = arith.truncf %49 : vector<1x49xf32> to vector<1x49xbf16>
    %c0_21 = arith.constant 0 : index
    %c196 = arith.constant 196 : index
    %51 = vector.load %arg12[%c0_21, %c196] : memref<2x256xbf16, #tpu.memory_space<vmem>>, vector<1x49xbf16>
    tpu.vector_store %arg12[%c0_21, %c196], %50 {strides = array<i32>} : memref<2x256xbf16, #tpu.memory_space<vmem>>, vector<1x49xbf16>,
    %52 = vector.extract_strided_slice %34 {offsets = [0, 49], sizes = [1, 49], strides = [1, 1]} : vector<5x98xf32> to vector<1x49xf32>
    %53 = arith.truncf %52 : vector<1x49xf32> to vector<1x49xbf16>
    %c1 = arith.constant 1 : index
    %c0_22 = arith.constant 0 : index
    %54 = vector.load %arg12[%c1, %c0_22] : memref<2x256xbf16, #tpu.memory_space<vmem>>, vector<1x49xbf16>
    tpu.vector_store %arg12[%c1, %c0_22], %53 {strides = array<i32>} : memref<2x256xbf16, #tpu.memory_space<vmem>>, vector<1x49xbf16>,
    %55 = vector.extract_strided_slice %34 {offsets = [1, 49], sizes = [1, 49], strides = [1, 1]} : vector<5x98xf32> to vector<1x49xf32>
    %56 = arith.truncf %55 : vector<1x49xf32> to vector<1x49xbf16>
    %c1_23 = arith.constant 1 : index
    %c49_24 = arith.constant 49 : index
    %57 = vector.load %arg12[%c1_23, %c49_24] : memref<2x256xbf16, #tpu.memory_space<vmem>>, vector<1x49xbf16>
    tpu.vector_store %arg12[%c1_23, %c49_24], %56 {strides = array<i32>} : memref<2x256xbf16, #tpu.memory_space<vmem>>, vector<1x49xbf16>,
    %58 = vector.extract_strided_slice %34 {offsets = [2, 49], sizes = [1, 49], strides = [1, 1]} : vector<5x98xf32> to vector<1x49xf32>
    %59 = arith.truncf %58 : vector<1x49xf32> to vector<1x49xbf16>
    %c1_25 = arith.constant 1 : index
    %c98_26 = arith.constant 98 : index
    %60 = vector.load %arg12[%c1_25, %c98_26] : memref<2x256xbf16, #tpu.memory_space<vmem>>, vector<1x49xbf16>
    tpu.vector_store %arg12[%c1_25, %c98_26], %59 {strides = array<i32>} : memref<2x256xbf16, #tpu.memory_space<vmem>>, vector<1x49xbf16>,
    %61 = vector.extract_strided_slice %34 {offsets = [3, 49], sizes = [1, 49], strides = [1, 1]} : vector<5x98xf32> to vector<1x49xf32>
    %62 = arith.truncf %61 : vector<1x49xf32> to vector<1x49xbf16>
    %c1_27 = arith.constant 1 : index
    %c147_28 = arith.constant 147 : index
    %63 = vector.load %arg12[%c1_27, %c147_28] : memref<2x256xbf16, #tpu.memory_space<vmem>>, vector<1x49xbf16>
    tpu.vector_store %arg12[%c1_27, %c147_28], %62 {strides = array<i32>} : memref<2x256xbf16, #tpu.memory_space<vmem>>, vector<1x49xbf16>,
    %64 = vector.extract_strided_slice %34 {offsets = [4, 49], sizes = [1, 49], strides = [1, 1]} : vector<5x98xf32> to vector<1x49xf32>
    %65 = arith.truncf %64 : vector<1x49xf32> to vector<1x49xbf16>
    %c1_29 = arith.constant 1 : index
    %c196_30 = arith.constant 196 : index
    %66 = vector.load %arg12[%c1_29, %c196_30] : memref<2x256xbf16, #tpu.memory_space<vmem>>, vector<1x49xbf16>
    tpu.vector_store %arg12[%c1_29, %c196_30], %65 {strides = array<i32>} : memref<2x256xbf16, #tpu.memory_space<vmem>>, vector<1x49xbf16>,
    %c0_31 = arith.constant 0 : index
    %c0_32 = arith.constant 0 : index
    %67 = vector.load %arg12[%c0_31, %c0_32] : memref<2x256xbf16, #tpu.memory_space<vmem>>, vector<2x256xbf16>
    %c0_33 = arith.constant 0 : index
    %c0_34 = arith.constant 0 : index
    %68 = vector.load %arg5[%c0_33, %c0_34] : memref<256x1024xbf16, #tpu.memory_space<vmem>>, vector<256x1024xbf16>
    %cst_35 = arith.constant dense<0.000000e+00> : vector<2x1024xf32>
    %69 = tpu.matmul %67, %68, %cst_35 {dimension_numbers = #tpu.dot_dimension_numbers<[1], [0], [0], [1], [0, 0, 1, 1], [], []>} : vector<2x256xbf16>, vector<256x1024xbf16>, vector<2x1024xf32> -> vector<2x1024xf32>
    %c0_36 = arith.constant 0 : index
    %c0_37 = arith.constant 0 : index
    %70 = vector.load %arg6[%c0_36, %c0_37] : memref<1x1024xf32, #tpu.memory_space<vmem>>, vector<1x1024xf32>
    %71 = vector.broadcast %70 : vector<1x1024xf32> to vector<2x1024xf32>
    %72 = arith.addf %69, %71 : vector<2x1024xf32>
    %cst_38 = arith.constant 0.000000e+00 : f32
    %73 = vector.broadcast %cst_38 : f32 to vector<2x1024xf32>
    %74 = arith.maximumf %72, %73 : vector<2x1024xf32>
    %75 = arith.truncf %74 : vector<2x1024xf32> to vector<2x1024xbf16>
    %c0_39 = arith.constant 0 : index
    %c0_40 = arith.constant 0 : index
    %76 = vector.load %arg7[%c0_39, %c0_40] : memref<1024x128xbf16, #tpu.memory_space<vmem>>, vector<1024x128xbf16>
    %cst_41 = arith.constant dense<0.000000e+00> : vector<2x128xf32>
    %77 = tpu.matmul %75, %76, %cst_41 {dimension_numbers = #tpu.dot_dimension_numbers<[1], [0], [0], [1], [0, 0, 1, 1], [], []>} : vector<2x1024xbf16>, vector<1024x128xbf16>, vector<2x128xf32> -> vector<2x128xf32>
    %c0_42 = arith.constant 0 : index
    %c0_43 = arith.constant 0 : index
    %78 = vector.load %arg8[%c0_42, %c0_43] : memref<1x128xf32, #tpu.memory_space<vmem>>, vector<1x128xf32>
    %79 = vector.broadcast %78 : vector<1x128xf32> to vector<2x128xf32>
    %80 = arith.addf %77, %79 : vector<2x128xf32>
    %cst_44 = arith.constant 0.000000e+00 : f32
    %81 = vector.broadcast %cst_44 : f32 to vector<2x128xf32>
    %82 = arith.maximumf %80, %81 : vector<2x128xf32>
    %83 = arith.truncf %82 : vector<2x128xf32> to vector<2x128xbf16>
    %c0_45 = arith.constant 0 : index
    %c0_46 = arith.constant 0 : index
    %84 = vector.load %arg9[%c0_45, %c0_46] : memref<128x10xbf16, #tpu.memory_space<vmem>>, vector<128x10xbf16>
    %cst_47 = arith.constant dense<0.000000e+00> : vector<2x10xf32>
    %85 = tpu.matmul %83, %84, %cst_47 {dimension_numbers = #tpu.dot_dimension_numbers<[1], [0], [0], [1], [0, 0, 1, 1], [], []>} : vector<2x128xbf16>, vector<128x10xbf16>, vector<2x10xf32> -> vector<2x10xf32>
    %c0_48 = arith.constant 0 : index
    %c0_49 = arith.constant 0 : index
    %86 = vector.load %arg10[%c0_48, %c0_49] : memref<1x10xf32, #tpu.memory_space<vmem>>, vector<1x10xf32>
    %87 = vector.broadcast %86 : vector<1x10xf32> to vector<2x10xf32>
    %88 = arith.addf %85, %87 : vector<2x10xf32>
    %c0_50 = arith.constant 0 : index
    %c0_51 = arith.constant 0 : index
    %89 = vector.load %arg11[%c0_50, %c0_51] : memref<2x10xf32, #tpu.memory_space<vmem>>, vector<2x10xf32>
    tpu.vector_store %arg11[%c0_50, %c0_51], %88 {strides = array<i32>} : memref<2x10xf32, #tpu.memory_space<vmem>>, vector<2x10xf32>,
    return
  }
  func.func @transform_0(%arg0: i32) -> (i32, i32) {
    %c0_i32 = arith.constant 0 : i32
    %c0_i32_0 = arith.constant 0 : i32
    %c0_i32_1 = arith.constant 0 : i32
    return %c0_i32, %c0_i32_0 : i32, i32
  }
  func.func @transform_1(%arg0: i32) -> (i32, i32) {
    %c0_i32 = arith.constant 0 : i32
    %c0_i32_0 = arith.constant 0 : i32
    %c0_i32_1 = arith.constant 0 : i32
    return %c0_i32, %c0_i32_0 : i32, i32
  }
  func.func @transform_2(%arg0: i32) -> (i32, i32) {
    %c0_i32 = arith.constant 0 : i32
    %c0_i32_0 = arith.constant 0 : i32
    %c0_i32_1 = arith.constant 0 : i32
    return %c0_i32, %c0_i32_0 : i32, i32
  }
  func.func @transform_3(%arg0: i32) -> (i32, i32) {
    %c0_i32 = arith.constant 0 : i32
    %c0_i32_0 = arith.constant 0 : i32
    %c0_i32_1 = arith.constant 0 : i32
    return %c0_i32, %c0_i32_0 : i32, i32
  }
  func.func @transform_4(%arg0: i32) -> (i32, i32) {
    %c0_i32 = arith.constant 0 : i32
    %c0_i32_0 = arith.constant 0 : i32
    %c0_i32_1 = arith.constant 0 : i32
    return %c0_i32, %c0_i32_0 : i32, i32
  }
  func.func @transform_5(%arg0: i32) -> (i32, i32) {
    %c0_i32 = arith.constant 0 : i32
    %c0_i32_0 = arith.constant 0 : i32
    %c0_i32_1 = arith.constant 0 : i32
    return %c0_i32, %c0_i32_0 : i32, i32
  }
  func.func @transform_6(%arg0: i32) -> (i32, i32) {
    %c0_i32 = arith.constant 0 : i32
    %c0_i32_0 = arith.constant 0 : i32
    %c0_i32_1 = arith.constant 0 : i32
    return %c0_i32, %c0_i32_0 : i32, i32
  }
  func.func @transform_7(%arg0: i32) -> (i32, i32) {
    %c0_i32 = arith.constant 0 : i32
    %c0_i32_0 = arith.constant 0 : i32
    %c0_i32_1 = arith.constant 0 : i32
    return %c0_i32, %c0_i32_0 : i32, i32
  }
  func.func @transform_8(%arg0: i32) -> (i32, i32) {
    %c0_i32 = arith.constant 0 : i32
    %c0_i32_0 = arith.constant 0 : i32
    %c0_i32_1 = arith.constant 0 : i32
    return %c0_i32, %c0_i32_0 : i32, i32
  }
  func.func @transform_9(%arg0: i32) -> (i32, i32) {
    %c0_i32 = arith.constant 0 : i32
    %c0_i32_0 = arith.constant 0 : i32
    %c0_i32_1 = arith.constant 0 : i32
    return %c0_i32, %c0_i32_0 : i32, i32
  }
  func.func @transform_10(%arg0: i32) -> (i32, i32) {
    %c0_i32 = arith.constant 0 : i32
    %c0_i32_0 = arith.constant 0 : i32
    %c0_i32_1 = arith.constant 0 : i32
    return %c0_i32, %c0_i32_0 : i32, i32
  }
}

</mosaic_0001>

<bundles_post_ra>
// kernel: minist_net_forward.2
= control target key start
LH: loop header
LB: loop body
LE: loop exit
PB: predicated region body
PF: predicated region fallthrough
CT: control target
= control target key end

     0   :  { %9 = vsyncpa [#allocation3], 0  ;;  %s1011_s15 = smov [#allocation2]   ;;  %s1430_s0 = inlined_call_operand.vmem [shape: bf16[9,1800], index: 0, kind: input, shape index: {}]   ;;  %s1431_s1 = inlined_call_operand.hbm [shape: bf16[10,9], index: 1, kind: input, shape index: {}]   ;;  %s1432_s2 = inlined_call_operand.vmem [shape: f32[10,1], index: 2, kind: input, shape index: {}]   ;;  %s1433_s3 = inlined_call_operand.vmem [shape: f32[10,1], index: 3, kind: input, shape index: {}]   ;;  %s1434_s4 = inlined_call_operand.vmem [shape: bf16[10,1800], index: 4, kind: output, shape index: {}]  }
   0x1   :  { %s17_s16 = sshll.u32 %s1011_s15, 4  ;;  %s987_s19 = scalar_lea.hbm %s1431_s1, 128  ;;  %s18_s16 = int_to_ptr.vmem [resolvable:$true] %s17_s16 }
   0x2   :  { %p988_p0 = scmp.ne.s32.totalorder %s1431_s1, %s987_s19  ;;  %p991_p1 = scmp.lt.u32.totalorder %s987_s19, %s1431_s1 }
   0x4   :  { %p993_p2 = pnand %p991_p1, %p988_p0 }
   0x6   :  { %996 = shalt.err (!%p993_p2)
}
   0x7   :  { %s997_s24 = scalar_lea.vmem %s18_s16, 128  ;;  %p1002_p4 = scmp.lt.s32.totalorder %s18_s16, %s18_s16 }
   0x8   :  { %p998_p3 = scmp.ne.s32.totalorder %s18_s16, %s997_s24  ;;  %p1003_p5 = scmp.lt.s32.totalorder %s997_s24, %s997_s24 }
   0xa   :  { %p1004_p6 = por %p1003_p5, %p1002_p4 }
   0xc   :  { %p1005_p7 = pnand %p1004_p6, %p998_p3 }
   0xe   :  { %1008 = shalt.err (!%p1005_p7)
}
   0xf   :  { %s1012_s25 = smov 64   ;;  %s1013_s26 = smov 4  }
  0x10   :  { %23 = dma.hbm_to_vmem [thread:$0]  %s1431_s1, 128, %s18_s16, [#allocation3], %s1012_s25, %s1012_s25, %s1013_s26  }
  0x11   :  { %1009 = dma.done.wait [#allocation3], 128  }
  0x12   :  { %1010 = vsyncadd [#allocation3], 4294967168  ;;  %vm120_vm0 = vcmask 1043456   ;;  %v1014_v0 = vmov 0   ;;  %vm121_vm1 = vcmask 1044480   ;;  %v1015_v1 = vmov 65535  }
  0x13   :  { %201 = vmatprep.mubr.bf16.mxu0 %v1014_v0  ;;  %244 = vmatprep.mubr.bf16.mxu1 %v1014_v0  ;;  %v122_v2 = vsel %vm120_vm0, 4294967295, %v1015_v1  ;;  %vm116_vm2 = vcmask 72704   ;;  %v960_v4 = vld [vmem:[%s1430_s0 + $0x4] ss:$60 sps:$4 sm:$0x1f]   ;;  %v1016_v33 = vmov 0.0  }
  0x14   :  { %958 = vset.pattern.permute.xlu0 %v1014_v0  ;;  %959 = vset.pattern.permute.xlu1 %v1014_v0  ;;  %v123_v3 = vsel %vm121_vm1, %v122_v2, 0  ;;  %v962_v5 = vld [vmem:[%s1430_s0] ss:$60 sps:$4 sm:$0x1f]   ;;  %vm1017_vm3 = vmmov 0   ;;  %vm529_vm4 = vcmask 1041408  }
  0x15   :  { %v128_v6 = vand.u32 %v960_v4, %v123_v3  ;;  %v963_v7 = vld [vmem:[%s1430_s0 + $0xc] ss:$60 sps:$4 sm:$0x1f]   ;;  %v125_v9 = vand.u32 %v962_v5, %v123_v3  ;;  %v966_v10 = vld [vmem:[#allocation2] sm:$0x1f]   ;;  %vm524_vm5 = vcmask 64512  }
  0x16   :  { %v965_v8 = vld [vmem:[%s1430_s0 + $0x8] ss:$60 sps:$4 sm:$0x1f]   ;;  %v134_v11 = vand.u32 %v963_v7, %v123_v3  ;;  %v967_v13 = vld [vmem:[%s1430_s0 + $0x10] ss:$60 sps:$4 sm:$0x1f]  }
  0x17   :  { %169 = vmatprep.subr.bf16.mxu0 %v128_v6  ;;  %v131_v12 = vand.u32 %v965_v8, %v123_v3  ;;  %v969_v14 = vld [vmem:[%s1430_s0 + $0x14] ss:$60 sps:$4 sm:$0x1f]   ;;  %v137_v15 = vand.u32 %v967_v13, %v123_v3  ;;  %v972_v17 = vld [vmem:[%s1430_s0 + $0x1c] ss:$60 sps:$4 sm:$0x1f]  }
  0x18   :  { %170 = vmatpush1.bf16.msra.mxu0 %v125_v9  ;;  %212 = vmatprep.subr.bf16.mxu1 %v134_v11  ;;  %v970_v16 = vld [vmem:[%s1430_s0 + $0x18] ss:$60 sps:$4 sm:$0x1f]   ;;  %v140_v18 = vand.u32 %v969_v14, %v123_v3  ;;  %v146_v19 = vand.u32 %v972_v17, %v123_v3  ;;  %v975_v21 = vld [vmem:[%s1430_s0 + $0x24] ss:$60 sps:$4 sm:$0x1f]  }
  0x19   :  { %213 = vmatpush1.bf16.msra.mxu1 %v131_v12  ;;  %v143_v20 = vand.u32 %v970_v16, %v123_v3  ;;  %v973_v22 = vld [vmem:[%s1430_s0 + $0x20] ss:$60 sps:$4 sm:$0x1f]   ;;  %v978_v23 = vld [vmem:[%s1430_s0 + $0x2c] ss:$60 sps:$4 sm:$0x1f]   ;;  %v152_v24 = vand.u32 %v975_v21, %v123_v3 }
  0x1a   :  { %255 = vmatprep.subr.bf16.mxu0 %v140_v18  ;;  %v976_v25 = vld [vmem:[%s1430_s0 + $0x28] ss:$60 sps:$4 sm:$0x1f]   ;;  %298 = vmatprep.subr.bf16.mxu1 %v146_v19  ;;  %v158_v26 = vand.u32 %v978_v23, %v123_v3  ;;  %v981_v27 = vld [vmem:[%s1430_s0 + $0x34] ss:$60 sps:$4 sm:$0x1f]   ;;  %v149_v28 = vand.u32 %v973_v22, %v123_v3 }
  0x1b   :  { %903 = vmatmul.mubr.msk.bf16.vlgmr.msra.gmra.mrb[0].mxu0 %vm116_vm2, %v966_v10  ;;  %v164_v29 = vand.u32 %v981_v27, %v123_v3  ;;  %v155_v30 = vand.u32 %v976_v25, %v123_v3  ;;  %v979_v31 = vld [vmem:[%s1430_s0 + $0x30] ss:$60 sps:$4 sm:$0x1f]   ;;  %v982_v32 = vld [vmem:[%s1430_s0 + $0x38] ss:$60 sps:$4 sm:$0x1f]  }
  0x1c   :  { %287 = vmatprep.mubr.bf16.mxu0 %v1014_v0  ;;  %904 = vmatmul.mubr.msk.bf16.vlgmr.msra.gmra.mrb[0].mxu1 %vm116_vm2, %v966_v10  ;;  %v161_v34 = vand.u32 %v979_v31, %v123_v3  ;;  %v167_v35 = vand.u32 %v982_v32, %v123_v3  ;;  %vm557_vm6 = vcmask 58368   ;;  %vm871_vm7 = vcmask 60416  }
  0x1d   :  { %256 = vmatpush1.bf16.msra.mxu0 %v137_v15  ;;  %330 = vmatprep.mubr.bf16.mxu1 %v1014_v0  ;;  %vm880_vm8 = vcmask 57344  }
  0x1e   :  { %299 = vmatpush1.bf16.msra.mxu1 %v143_v20  ;;  %341 = vmatprep.subr.bf16.mxu0 %v152_v24 }
  0x1f   :  { %384 = vmatprep.subr.bf16.mxu1 %v158_v26 }
  0x23   :  { %905 = vmatmul.mubr.msk.bf16.vlgmr.msra.gmra.mrb[4].mxu0 %vm116_vm2, %v966_v10 }
  0x24   :  { %342 = vmatpush1.bf16.msra.mxu0 %v149_v28  ;;  %373 = vmatprep.mubr.bf16.mxu0 %v1014_v0 }
  0x25   :  { %906 = vmatmul.mubr.msk.bf16.vlgmr.msra.gmra.mrb[4].mxu1 %vm116_vm2, %v966_v10  ;;  %427 = vmatprep.subr.bf16.mxu0 %v164_v29 }
  0x26   :  { %385 = vmatpush1.bf16.msra.mxu1 %v155_v30  ;;  %416 = vmatprep.mubr.bf16.mxu1 %v1014_v0 }
  0x27   :  { %945 = vmatprep.subr.bf16.mxu1 %v1016_v33 }
  0x2b   :  { %907 = vmatmul.mubr.msk.bf16.vlgmr.msra.gmra.mrb[8].mxu0 %vm116_vm2, %v966_v10 }
  0x2c   :  { %428 = vmatpush1.bf16.msra.mxu0 %v161_v34  ;;  %459 = vmatprep.mubr.bf16.mxu0 %v1014_v0 }
  0x2d   :  { %908 = vmatmul.mubr.msk.bf16.vlgmr.msra.gmra.mrb[8].mxu1 %vm116_vm2, %v966_v10 }
  0x2e   :  { %946 = vmatpush3.bf16.msra.mxu1 %v167_v35  ;;  %947 = vmatprep.mubr.msk.bf16.mxu1 %vm1017_vm3, %v1016_v33 }
  0x33   :  { %909 = vmatmul.mubr.msk.bf16.vlgmr.msra.gmra.mrb[12].mxu0 %vm116_vm2, %v966_v10 }
  0x35   :  { %948 = vmatmul.mubr.msk.bf16.vlgmr.msra.gmra.mrb[12].mxu1 %vm116_vm2, %v966_v10 }
  0xee   :  { %v1117_v36 = vpop.f32.mrb[0].mxu0 }
  0xef   :  { %v564_v37 = vmul.f32 %v1117_v36, %v1117_v36  ;;  %v1121_v38 = vpop.f32.mrb[1].mxu0  ;;  %v1127_v41 = vpop.f32.mrb[0].mxu1 }
  0xf0   :  { %v511_v39 = vadd.f32 %v1121_v38, %v1117_v36  ;;  %v565_v40 = vmul.f32 %v1121_v38, %v1121_v38  ;;  %v1129_v42 = vpop.f32.mrb[2].mxu0  ;;  %v566_v43 = vmul.f32 %v1127_v41, %v1127_v41  ;;  %v1137_v46 = vpop.f32.mrb[1].mxu1 }
  0xf1   :  { %v530_v44 = vsel %vm529_vm4, %v1129_v42, 0.0  ;;  %v579_v45 = vmul.f32 %v1129_v42, %v1129_v42  ;;  %v1139_v47 = vpop.f32.mrb[3].mxu0  ;;  %v1144_v51 = vpop.f32.mrb[2].mxu1  ;;  %v567_v53 = vmul.f32 %v1137_v46, %v1137_v46 }
  0xf2   :  { %v594_v48 = vadd.f32 %v565_v40, %v564_v37  ;;  %v512_v49 = vadd.f32 %v511_v39, %v1127_v41  ;;  %v531_v50 = vsel %vm529_vm4, %v1139_v47, 0.0  ;;  %v580_v55 = vmul.f32 %v1139_v47, %v1139_v47  ;;  %v1151_v56 = vpop.f32.mrb[3].mxu1 }
  0xf3   :  { %v611_v52 = vsel %vm529_vm4, %v579_v45, 0.0  ;;  %v532_v54 = vadd.f32 %v531_v50, %v530_v44  ;;  %v533_v59 = vsel %vm529_vm4, %v1144_v51, 0.0  ;;  %v581_v60 = vmul.f32 %v1144_v51, %v1144_v51 }
  0xf4   :  { %v595_v57 = vadd.f32 %v594_v48, %v566_v43  ;;  %v513_v58 = vadd.f32 %v512_v49, %v1137_v46  ;;  %v612_v61 = vsel %vm529_vm4, %v580_v55, 0.0  ;;  %v582_v63 = vmul.f32 %v1151_v56, %v1151_v56 }
  0xf5   :  { %v534_v62 = vadd.f32 %v533_v59, %v532_v54  ;;  %v613_v1 = vadd.f32 %v612_v61, %v611_v52  ;;  %v535_v2 = vsel %vm529_vm4, %v1151_v56, 0.0  ;;  %v614_v4 = vsel %vm529_vm4, %v581_v60, 0.0 }
  0xf6   :  { %v596_v0 = vadd.f32 %v595_v57, %v567_v53  ;;  %v1163_v3 = vpop.f32.mrb[4].mxu0  ;;  %v616_v10 = vsel %vm529_vm4, %v582_v63, 0.0 }
  0xf7   :  { %v536_v5 = vadd.f32 %v535_v2, %v534_v62  ;;  %v514_v6 = vadd.f32 %v513_v58, %v1163_v3  ;;  %v568_v7 = vmul.f32 %v1163_v3, %v1163_v3  ;;  %v1169_v8 = vpop.f32.mrb[5].mxu0  ;;  %v615_v9 = vadd.f32 %v614_v4, %v613_v1 }
  0xf8   :  { %v569_v11 = vmul.f32 %v1169_v8, %v1169_v8  ;;  %v1174_v12 = vpop.f32.mrb[4].mxu1  ;;  %v1176_v13 = vpop.f32.mrb[6].mxu0 }
  0xf9   :  { %v597_v14 = vadd.f32 %v596_v0, %v568_v7  ;;  %v515_v15 = vadd.f32 %v514_v6, %v1169_v8  ;;  %v570_v16 = vmul.f32 %v1174_v12, %v1174_v12  ;;  %v537_v17 = vsel %vm529_vm4, %v1176_v13, 0.0  ;;  %v1183_v18 = vpop.f32.mrb[5].mxu1  ;;  %v1185_v19 = vpop.f32.mrb[7].mxu0 }
  0xfa   :  { %v617_v20 = vadd.f32 %v616_v10, %v615_v9  ;;  %v538_v21 = vadd.f32 %v537_v17, %v536_v5  ;;  %v583_v22 = vmul.f32 %v1176_v13, %v1176_v13  ;;  %v571_v23 = vmul.f32 %v1183_v18, %v1183_v18  ;;  %v1191_v24 = vpop.f32.mrb[6].mxu1 }
  0xfb   :  { %v598_v25 = vadd.f32 %v597_v14, %v569_v11  ;;  %v516_v26 = vadd.f32 %v515_v15, %v1174_v12  ;;  %v539_v27 = vsel %vm529_vm4, %v1185_v19, 0.0  ;;  %v584_v28 = vmul.f32 %v1185_v19, %v1185_v19  ;;  %v1198_v29 = vpop.f32.mrb[7].mxu1 }
  0xfc   :  { %v618_v30 = vsel %vm529_vm4, %v583_v22, 0.0  ;;  %v540_v31 = vadd.f32 %v539_v27, %v538_v21  ;;  %v541_v32 = vsel %vm529_vm4, %v1191_v24, 0.0  ;;  %v585_v33 = vmul.f32 %v1191_v24, %v1191_v24 }
  0xfd   :  { %v599_v34 = vadd.f32 %v598_v25, %v570_v16  ;;  %v619_v35 = vadd.f32 %v618_v30, %v617_v20  ;;  %v517_v37 = vadd.f32 %v516_v26, %v1183_v18  ;;  %v620_v39 = vsel %vm529_vm4, %v584_v28, 0.0 }
  0xfe   :  { %v542_v40 = vadd.f32 %v541_v32, %v540_v31  ;;  %v543_v43 = vsel %vm529_vm4, %v1198_v29, 0.0  ;;  %v586_v44 = vmul.f32 %v1198_v29, %v1198_v29  ;;  %v1211_v45 = vpop.f32.mrb[8].mxu0  ;;  %v622_v54 = vsel %vm529_vm4, %v585_v33, 0.0 }
  0xff   :  { %v600_v48 = vadd.f32 %v599_v34, %v571_v23  ;;  %v621_v49 = vadd.f32 %v620_v39, %v619_v35  ;;  %v518_v50 = vadd.f32 %v517_v37, %v1211_v45  ;;  %v572_v52 = vmul.f32 %v1211_v45, %v1211_v45  ;;  %v1216_v53 = vpop.f32.mrb[9].mxu0 }
 0x100   :  { %v544_v55 = vadd.f32 %v543_v43, %v542_v40  ;;  %v573_v57 = vmul.f32 %v1216_v53, %v1216_v53  ;;  %v1221_v58 = vpop.f32.mrb[8].mxu1  ;;  %v1223_v59 = vpop.f32.mrb[10].mxu0  ;;  %v624_v2 = vsel %vm529_vm4, %v586_v44, 0.0 }
 0x101   :  { %v623_v60 = vadd.f32 %v622_v54, %v621_v49  ;;  %v601_v61 = vadd.f32 %v600_v48, %v572_v52  ;;  %v519_v62 = vadd.f32 %v518_v50, %v1216_v53  ;;  %v574_v63 = vmul.f32 %v1221_v58, %v1221_v58  ;;  %v1228_v0 = vpop.f32.mrb[9].mxu1  ;;  %v1230_v1 = vpop.f32.mrb[11].mxu0 }
 0x102   :  { %v545_v4 = vsel %vm529_vm4, %v1223_v59, 0.0  ;;  %v587_v5 = vmul.f32 %v1223_v59, %v1223_v59  ;;  %v547_v6 = vsel %vm529_vm4, %v1230_v1, 0.0  ;;  %v1239_v7 = vpop.f32.mrb[10].mxu1  ;;  %v575_v17 = vmul.f32 %v1228_v0, %v1228_v0 }
 0x103   :  { %v625_v9 = vadd.f32 %v624_v2, %v623_v60  ;;  %v602_v10 = vadd.f32 %v601_v61, %v573_v57  ;;  %v520_v11 = vadd.f32 %v519_v62, %v1221_v58  ;;  %v546_v14 = vadd.f32 %v545_v4, %v544_v55  ;;  %v1242_v15 = vpop.f32.mrb[11].mxu1 }
 0x104   :  { %v626_v16 = vsel %vm529_vm4, %v587_v5, 0.0  ;;  %v588_v20 = vmul.f32 %v1230_v1, %v1230_v1  ;;  %v589_v21 = vmul.f32 %v1239_v7, %v1239_v7  ;;  %v549_v28 = vsel %vm529_vm4, %v1239_v7, 0.0 }
 0x105   :  { %v603_v22 = vadd.f32 %v602_v10, %v574_v63  ;;  %v627_v23 = vadd.f32 %v626_v16, %v625_v9  ;;  %v521_v25 = vadd.f32 %v520_v11, %v1228_v0  ;;  %v548_v26 = vadd.f32 %v547_v6, %v546_v14 }
 0x106   :  { %v628_v27 = vsel %vm529_vm4, %v588_v20, 0.0  ;;  %v630_v30 = vsel %vm529_vm4, %v589_v21, 0.0  ;;  %v590_v31 = vmul.f32 %v1242_v15, %v1242_v15  ;;  %v1258_v32 = vpop.f32.mrb[12].mxu0  ;;  %v551_v40 = vsel %vm529_vm4, %v1242_v15, 0.0 }
 0x107   :  { %v604_v33 = vadd.f32 %v603_v22, %v575_v17  ;;  %v629_v34 = vadd.f32 %v628_v27, %v627_v23  ;;  %v550_v35 = vadd.f32 %v549_v28, %v548_v26  ;;  %v522_v37 = vadd.f32 %v521_v25, %v1258_v32  ;;  %v1261_v39 = vpop.f32.mrb[13].mxu0 }
 0x108   :  { %v632_v43 = vsel %vm529_vm4, %v590_v31, 0.0  ;;  %v576_v44 = vmul.f32 %v1258_v32, %v1258_v32  ;;  %v577_v48 = vmul.f32 %v1261_v39, %v1261_v39  ;;  %v1270_v49 = vpop.f32.mrb[12].mxu1  ;;  %v1272_v50 = vpop.f32.mrb[14].mxu0 }
 0x109   :  { %v631_v52 = vadd.f32 %v630_v30, %v629_v34  ;;  %v552_v54 = vadd.f32 %v551_v40, %v550_v35  ;;  %v553_v55 = vsel %vm529_vm4, %v1272_v50, 0.0  ;;  %v591_v57 = vmul.f32 %v1272_v50, %v1272_v50  ;;  %v949_v60 = vpop.f32.mrb[13].mxu1  ;;  %v1278_v61 = vpop.f32.mrb[15].mxu0 }
 0x10a   :  { %v555_v62 = vsel %vm529_vm4, %v1278_v61, 0.0  ;;  %v592_v63 = vmul.f32 %v1278_v61, %v1278_v61  ;;  %v1284_v2 = vpop.f32.mrb[14].mxu1  ;;  %v523_v4 = vadd.f32 %v522_v37, %v1261_v39  ;;  %v525_v5 = vsel %vm524_vm5, %v1270_v49, 0.0 }
 0x10b   :  { %v633_v6 = vadd.f32 %v632_v43, %v631_v52  ;;  %v554_v9 = vadd.f32 %v553_v55, %v552_v54  ;;  %v634_v10 = vsel %vm529_vm4, %v591_v57, 0.0  ;;  %v593_v11 = vmul.f32 %v1284_v2, %v1284_v2  ;;  %v950_v14 = vpop.f32.mrb[15].mxu1 }
 0x10c   :  { %v636_v16 = vsel %vm529_vm4, %v592_v63, 0.0  ;;  %v526_v17 = vadd.f32 %v525_v5, %v523_v4  ;;  %v578_v20 = vmul.f32 %v1270_v49, %v1270_v49  ;;  %v605_v21 = vadd.f32 %v604_v33, %v576_v44  ;;  %v644_v5 = vld [vmem:[%s1432_s2] sm:$0xff] }
 0x10d   :  { %v556_v22 = vadd.f32 %v555_v62, %v554_v9  ;;  %v635_v23 = vadd.f32 %v634_v10, %v633_v6  ;;  %v558_v27 = vsel %vm557_vm6, %v1284_v2, 0.0  ;;  %v638_v34 = vsel %vm557_vm6, %v593_v11, 0.0  ;;  %v645_v10 = vld [vmem:[%s1432_s2 + $0x8] sm:$0x3] }
 0x10e   :  { %527 = vadd.xlane.f32.xlu0 %v526_v17  ;;  %v606_v25 = vadd.f32 %v605_v21, %v577_v48  ;;  %v607_v26 = vsel %vm524_vm5, %v578_v20, 0.0  ;;  %v656_v17 = vld [vmem:[%s1433_s3] sm:$0xff] }
 0x10f   :  { %v559_v28 = vadd.f32 %v558_v27, %v556_v22  ;;  %v637_v30 = vadd.f32 %v636_v16, %v635_v23  ;;  %v657_v22 = vld [vmem:[%s1433_s3 + $0x8] sm:$0x3] }
 0x110   :  { %v608_v31 = vadd.f32 %v607_v26, %v606_v25 }
 0x111   :  { %v639_v35 = vadd.f32 %v638_v34, %v637_v30 }
 0x112   :  { %609 = vadd.xlane.f32.xlu1 %v608_v31  ;;  %560 = vadd.xlane.f32.xlu0 %v559_v28 }
 0x116   :  { %640 = vadd.xlane.f32.xlu1 %v639_v35 }
 0x19b   :  { %v528_v37 = vpop.xlane.xlu0 %527 }
 0x19c   :  { %v562_v33 = vmul.f32 0.00055555557, %v528_v37 }
 0x19e   :  { %v646_v40 = vmul.f32 %v562_v33, %v562_v33 }
 0x19f   :  { %v610_v43 = vpop.xlane.xlu1 %609  ;;  %v561_v44 = vpop.xlane.xlu0 %560 }
 0x1a0   :  { %v642_v48 = vmul.f32 0.00055555557, %v610_v43  ;;  %v563_v52 = vmul.f32 0.00055555557, %v561_v44 }
 0x1a2   :  { %v648_v54 = vsub.f32 %v642_v48, %v646_v40  ;;  %v647_v55 = vmul.f32 %v563_v52, %v563_v52 }
 0x1a3   :  { %v641_v57 = vpop.xlane.xlu1 %640 }
 0x1a4   :  { %v650_v60 = vadd.f32 1e-05, %v648_v54  ;;  %v643_v62 = vmul.f32 0.00055555557, %v641_v57 }
 0x1a6   :  { %983 = vrsqrt.f32 %v650_v60  ;;  %v649_v63 = vsub.f32 %v643_v62, %v647_v55 }
 0x1a8   :  { %v651_v4 = vadd.f32 1e-05, %v649_v63 }
 0x1aa   :  { %985 = vrsqrt.f32 %v651_v4 }
 0x1b0   :  { %v984_v6 = vpop.eup %983 }
 0x1b1   :  { %v654_v9 = vmul.f32 %v984_v6, %v644_v5 }
 0x1b3   :  { %664 = vperm.xlu0 %958, %v654_v9   ;;  %v658_v16 = vmul.f32 %v654_v9, %v562_v33 }
 0x1b4   :  { %v986_v11 = vpop.eup %985 }
 0x1b5   :  { %v655_v14 = vmul.f32 %v986_v11, %v645_v10  ;;  %v660_v20 = vsub.f32 %v656_v17, %v658_v16 }
 0x1b7   :  { %669 = vperm.xlu1 %959, %v655_v14   ;;  %v659_v21 = vmul.f32 %v655_v14, %v563_v52 }
 0x1b9   :  { %v661_v23 = vsub.f32 %v657_v22, %v659_v21 }
 0x1bb   :  { %704 = vperm.xlu1 %959, %v660_v20  }
 0x1bf   :  { %709 = vperm.xlu1 %959, %v661_v23  }
 0x232   :  { %v665_v25 = vpop.permute.xlu0 %664 }
 0x233   :  { %v672_v26 = vmul.f32 %v665_v25, %v1117_v36  ;;  %v673_v27 = vmul.f32 %v665_v25, %v1121_v38  ;;  %v674_v28 = vmul.f32 %v665_v25, %v1127_v41  ;;  %v675_v30 = vmul.f32 %v665_v25, %v1137_v46 }
 0x234   :  { %v676_v31 = vmul.f32 %v665_v25, %v1163_v3  ;;  %v677_v34 = vmul.f32 %v665_v25, %v1169_v8  ;;  %v678_v35 = vmul.f32 %v665_v25, %v1174_v12  ;;  %v679_v37 = vmul.f32 %v665_v25, %v1183_v18 }
 0x235   :  { %v680_v33 = vmul.f32 %v665_v25, %v1211_v45  ;;  %v681_v40 = vmul.f32 %v665_v25, %v1216_v53  ;;  %v682_v36 = vmul.f32 %v665_v25, %v1221_v58  ;;  %v683_v38 = vmul.f32 %v665_v25, %v1228_v0 }
 0x236   :  { %v684_v41 = vmul.f32 %v665_v25, %v1258_v32  ;;  %v685_v46 = vmul.f32 %v665_v25, %v1261_v39  ;;  %v670_v43 = vpop.permute.xlu1 %669  ;;  %v686_v3 = vmul.f32 %v665_v25, %v1270_v49 }
 0x237   :  { %v687_v8 = vmul.f32 %v670_v43, %v1129_v42  ;;  %v688_v12 = vmul.f32 %v670_v43, %v1139_v47  ;;  %v1329_v18 = vmul.f32 %v670_v43, %v1144_v51  ;;  %v1332_v45 = vmul.f32 %v670_v43, %v1151_v56 }
 0x238   :  { %v1335_v53 = vmul.f32 %v670_v43, %v1176_v13  ;;  %v1338_v58 = vmul.f32 %v670_v43, %v1185_v19  ;;  %v1341_v0 = vmul.f32 %v670_v43, %v1191_v24  ;;  %v1344_v32 = vmul.f32 %v670_v43, %v1198_v29 }
 0x239   :  { %v1347_v42 = vmul.f32 %v670_v43, %v1223_v59  ;;  %v1350_v47 = vmul.f32 %v670_v43, %v1230_v1  ;;  %v1353_v51 = vmul.f32 %v670_v43, %v1239_v7  ;;  %v1356_v13 = vmul.f32 %v670_v43, %v1242_v15 }
 0x23a   :  { %v705_v56 = vpop.permute.xlu1 %704  ;;  %v1359_v19 = vmul.f32 %v670_v43, %v1272_v50  ;;  %v1362_v24 = vmul.f32 %v670_v43, %v1278_v61  ;;  %v1365_v29 = vmul.f32 %v670_v43, %v1284_v2 }
 0x23b   :  { %v712_v59 = vadd.f32 %v705_v56, %v672_v26  ;;  %v713_v1 = vadd.f32 %v705_v56, %v673_v27  ;;  %v714_v39 = vadd.f32 %v705_v56, %v674_v28  ;;  %v715_v49 = vadd.f32 %v705_v56, %v675_v30 }
 0x23c   :  { %v716_v7 = vadd.f32 %v705_v56, %v676_v31  ;;  %v717_v44 = vadd.f32 %v705_v56, %v677_v34  ;;  %v718_v48 = vadd.f32 %v705_v56, %v678_v35  ;;  %v719_v52 = vadd.f32 %v705_v56, %v679_v37 }
 0x23d   :  { %v720_v15 = vadd.f32 %v705_v56, %v680_v33  ;;  %v721_v54 = vadd.f32 %v705_v56, %v681_v40  ;;  %v722_v55 = vadd.f32 %v705_v56, %v682_v36  ;;  %v723_v50 = vadd.f32 %v705_v56, %v683_v38 }
 0x23e   :  { %v724_v57 = vadd.f32 %v705_v56, %v684_v41  ;;  %v725_v60 = vadd.f32 %v705_v56, %v685_v46  ;;  %v726_v61 = vadd.f32 %v705_v56, %v686_v3  ;;  %v742_v62 = vmax.f32 %v712_v59, 0.0  ;;  %v710_v21 = vpop.permute.xlu1 %709 }
 0x23f   :  { %v743_v63 = vmax.f32 %v713_v1, 0.0  ;;  %v744_v2 = vmax.f32 %v714_v39, 0.0  ;;  %v745_v4 = vmax.f32 %v715_v49, 0.0  ;;  %v746_v5 = vmax.f32 %v716_v7, 0.0 }
 0x240   :  { %v747_v6 = vmax.f32 %v717_v44, 0.0  ;;  %v748_v9 = vmax.f32 %v718_v48, 0.0  ;;  %v749_v10 = vmax.f32 %v719_v52, 0.0  ;;  %v750_v11 = vmax.f32 %v720_v15, 0.0 }
 0x241   :  { %v751_v14 = vmax.f32 %v721_v54, 0.0  ;;  %v752_v16 = vmax.f32 %v722_v55, 0.0  ;;  %v753_v17 = vmax.f32 %v723_v50, 0.0  ;;  %v754_v20 = vmax.f32 %v724_v57, 0.0 }
 0x242   :  { %v755_v22 = vmax.f32 %v725_v60, 0.0  ;;  %v756_v23 = vmax.f32 %v726_v61, 0.0  ;;  %v927_v25 = vpack.c.bf16 %v743_v63, %v742_v62  ;;  %v928_v26 = vpack.c.bf16 %v745_v4, %v744_v2 }
 0x243   :  { %v929_v27 = vpack.c.bf16 %v747_v6, %v746_v5  ;;  %v930_v28 = vpack.c.bf16 %v749_v10, %v748_v9  ;;  %v931_v30 = vpack.c.bf16 %v751_v14, %v750_v11  ;;  %v932_v31 = vpack.c.bf16 %v753_v17, %v752_v16 }
 0x244   :  { %v933_v34 = vpack.c.bf16 %v755_v22, %v754_v20  ;;  %v934_v35 = vpack.c.bf16 %v756_v23, %v756_v23  ;;  %864 = vst [vmem:[%s1434_s4] sm:$0xff] %v927_v25  ;;  %865 = vst [vmem:[%s1434_s4 + $0x8] sm:$0xff] %v928_v26  ;;  %v727_v37 = vadd.f32 %v710_v21, %v687_v8 }
 0x245   :  { %v728_v33 = vadd.f32 %v710_v21, %v688_v12  ;;  %866 = vst [vmem:[%s1434_s4 + $0x10] sm:$0xff] %v929_v27  ;;  %867 = vst [vmem:[%s1434_s4 + $0x18] sm:$0xff] %v930_v28  ;;  %v729_v40 = vadd.f32 %v710_v21, %v1329_v18  ;;  %v730_v36 = vadd.f32 %v710_v21, %v1332_v45 }
 0x246   :  { %868 = vst [vmem:[%s1434_s4 + $0x20] sm:$0xff] %v931_v30  ;;  %869 = vst [vmem:[%s1434_s4 + $0x28] sm:$0xff] %v932_v31  ;;  %v731_v38 = vadd.f32 %v710_v21, %v1335_v53  ;;  %v732_v41 = vadd.f32 %v710_v21, %v1338_v58  ;;  %v733_v46 = vadd.f32 %v710_v21, %v1341_v0  ;;  %v757_v56 = vmax.f32 %v727_v37, 0.0 }
 0x247   :  { %870 = vst [vmem:[%s1434_s4 + $0x30] sm:$0xff] %v933_v34  ;;  %872 = vst.msk [vmem:[%s1434_s4 + $0x38] sm:$0xf] %vm871_vm7, %v934_v35  ;;  %v734_v43 = vadd.f32 %v710_v21, %v1344_v32  ;;  %v735_v3 = vadd.f32 %v710_v21, %v1347_v42  ;;  %v736_v8 = vadd.f32 %v710_v21, %v1350_v47  ;;  %v758_v59 = vmax.f32 %v728_v33, 0.0 }
 0x248   :  { %v737_v12 = vadd.f32 %v710_v21, %v1353_v51  ;;  %v738_v18 = vadd.f32 %v710_v21, %v1356_v13  ;;  %v739_v45 = vadd.f32 %v710_v21, %v1359_v19  ;;  %v740_v53 = vadd.f32 %v710_v21, %v1362_v24 }
 0x249   :  { %v741_v58 = vadd.f32 %v710_v21, %v1365_v29  ;;  %v759_v1 = vmax.f32 %v729_v40, 0.0  ;;  %v760_v0 = vmax.f32 %v730_v36, 0.0  ;;  %v761_v39 = vmax.f32 %v731_v38, 0.0 }
 0x24a   :  { %v762_v32 = vmax.f32 %v732_v41, 0.0  ;;  %v763_v49 = vmax.f32 %v733_v46, 0.0  ;;  %v764_v42 = vmax.f32 %v734_v43, 0.0  ;;  %v765_v7 = vmax.f32 %v735_v3, 0.0 }
 0x24b   :  { %v766_v47 = vmax.f32 %v736_v8, 0.0  ;;  %v767_v44 = vmax.f32 %v737_v12, 0.0  ;;  %v768_v51 = vmax.f32 %v738_v18, 0.0  ;;  %v769_v48 = vmax.f32 %v739_v45, 0.0 }
 0x24c   :  { %v770_v13 = vmax.f32 %v740_v53, 0.0  ;;  %v771_v52 = vmax.f32 %v741_v58, 0.0  ;;  %v935_v19 = vpack.c.bf16 %v758_v59, %v757_v56  ;;  %v936_v15 = vpack.c.bf16 %v760_v0, %v759_v1 }
 0x24d   :  { %v937_v24 = vpack.c.bf16 %v762_v32, %v761_v39  ;;  %v938_v54 = vpack.c.bf16 %v764_v42, %v763_v49  ;;  %v939_v29 = vpack.c.bf16 %v766_v47, %v765_v7  ;;  %v940_v55 = vpack.c.bf16 %v768_v51, %v767_v44 }
 0x24e   :  { %v941_v50 = vpack.c.bf16 %v770_v13, %v769_v48  ;;  %v942_v57 = vpack.c.bf16 %v771_v52, %v771_v52  ;;  %873 = vst [vmem:[%s1434_s4 + $0x3c] sm:$0x11] %v935_v19  ;;  %874 = vst [vmem:[%s1434_s4 + $0x44] sm:$0x11] %v936_v15 }
 0x24f   :  { %875 = vst [vmem:[%s1434_s4 + $0x4c] sm:$0x11] %v937_v24  ;;  %876 = vst [vmem:[%s1434_s4 + $0x54] sm:$0x11] %v938_v54 }
 0x250   :  { %877 = vst [vmem:[%s1434_s4 + $0x5c] sm:$0x11] %v939_v29  ;;  %878 = vst [vmem:[%s1434_s4 + $0x64] sm:$0x11] %v940_v55 }
 0x251   :  { %879 = vst [vmem:[%s1434_s4 + $0x6c] sm:$0x11] %v941_v50  ;;  %881 = vst.msk [vmem:[%s1434_s4 + $0x74] sm:$0x1] %vm880_vm8, %v942_v57 }
 0x252   :  { %886 = vsyncpa [#allocation3], 1 }

// kernel: minist_net_forward.3
= control target key start
LH: loop header
LB: loop body
LE: loop exit
PB: predicated region body
PF: predicated region fallthrough
CT: control target
= control target key end

     0   :  { %vm428_vm0 = vcmask 1044480   ;;  %vm424_vm1 = vcmask 998400   ;;  %s4176_s0 = inlined_call_operand.vmem [shape: bf16[250,392], index: 0, kind: input, shape index: {}]   ;;  %s4177_s1 = inlined_call_operand.vmem [shape: bf16[5,250], index: 1, kind: input, shape index: {}]   ;;  %s4178_s2 = inlined_call_operand.vmem [shape: f32[5,1], index: 2, kind: input, shape index: {}]   ;;  %s4179_s3 = inlined_call_operand.vmem [shape: f32[5,1], index: 3, kind: input, shape index: {}]   ;;  %s4180_s4 = inlined_call_operand.vmem [shape: bf16[256,1024], index: 4, kind: input, shape index: {}]   ;;  %s4181_s5 = inlined_call_operand.vmem [shape: f32[1,1024], index: 5, kind: input, shape index: {}]   ;;  %s4182_s6 = inlined_call_operand.vmem [shape: bf16[1024,128], index: 6, kind: input, shape index: {}]   ;;  %s4183_s7 = inlined_call_operand.vmem [shape: f32[1,128], index: 7, kind: input, shape index: {}]   ;;  %s4184_s8 = inlined_call_operand.vmem [shape: bf16[128,10], index: 8, kind: input, shape index: {}]   ;;  %s4185_s9 = inlined_call_operand.vmem [shape: f32[1,10], index: 9, kind: input, shape index: {}]   ;;  %s4186_s10 = inlined_call_operand.hbm [shape: f32[2,10], index: 10, kind: output, shape index: {}]  }
   0x1   :  { %v2980_v0 = vld [vmem:[%s4176_s0 + $0x4] ss:$16 sps:$4 sm:$0xff]   ;;  %v2982_v1 = vld [vmem:[%s4176_s0 + $0xc] ss:$16 sps:$4 sm:$0xff]   ;;  %v2984_v2 = vld [vmem:[%s4176_s0] ss:$16 sps:$4 sm:$0xff]  }
   0x2   :  { %441 = vmatprep.subr.bf16.mxu0 %v2980_v0  ;;  %v2985_v3 = vld [vmem:[%s4176_s0 + $0x8] ss:$16 sps:$4 sm:$0xff]   ;;  %482 = vmatprep.subr.bf16.mxu1 %v2982_v1  ;;  %v2986_v4 = vld [vmem:[%s4176_s0 + $0x24] ss:$16 sps:$4 sm:$0xff]   ;;  %v2988_v5 = vld [vmem:[%s4176_s0 + $0x2c] ss:$16 sps:$4 sm:$0xff]  }
   0x3   :  { %442 = vmatpush1.bf16.msra.mxu0 %v2984_v2  ;;  %483 = vmatpush1.bf16.msra.mxu1 %v2985_v3  ;;  %v2990_v6 = vld [vmem:[%s4176_s0 + $0x20] ss:$16 sps:$4 sm:$0xff]   ;;  %v2991_v7 = vld [vmem:[%s4176_s0 + $0x28] ss:$16 sps:$4 sm:$0xff]   ;;  %v2992_v8 = vld [vmem:[%s4176_s0 + $0x44] ss:$16 sps:$4 sm:$0xff]  }
   0x4   :  { %443 = vmatprep.subr.bf16.mxu0 %v2986_v4  ;;  %484 = vmatprep.subr.bf16.mxu1 %v2988_v5  ;;  %v2994_v9 = vld [vmem:[%s4176_s0 + $0x4c] ss:$16 sps:$4 sm:$0xff]   ;;  %v2996_v10 = vld [vmem:[%s4176_s0 + $0x40] ss:$16 sps:$4 sm:$0xff]   ;;  %v2997_v11 = vld [vmem:[%s4176_s0 + $0x48] ss:$16 sps:$4 sm:$0xff]  }
   0x5   :  { %v2998_v12 = vld [vmem:[%s4176_s0 + $0x64] ss:$16 sps:$4 sm:$0xff]   ;;  %v3000_v13 = vld [vmem:[%s4176_s0 + $0x6c] ss:$16 sps:$4 sm:$0xff]   ;;  %v3002_v14 = vld [vmem:[%s4176_s0 + $0x60] ss:$16 sps:$4 sm:$0xff]  }
   0x6   :  { %v3003_v15 = vld [vmem:[%s4176_s0 + $0x68] ss:$16 sps:$4 sm:$0xff]   ;;  %v3004_v16 = vld [vmem:[%s4176_s0 + $0x84] ss:$16 sps:$4 sm:$0xff]   ;;  %v3006_v17 = vld [vmem:[%s4176_s0 + $0x8c] ss:$16 sps:$4 sm:$0xff]  }
   0x7   :  { %444 = vmatpush1.bf16.msra.mxu0 %v2990_v6  ;;  %485 = vmatpush1.bf16.msra.mxu1 %v2991_v7  ;;  %v3008_v18 = vld [vmem:[%s4176_s0 + $0x80] ss:$16 sps:$4 sm:$0xff]   ;;  %v3009_v19 = vld [vmem:[%s4176_s0 + $0x88] ss:$16 sps:$4 sm:$0xff]   ;;  %v3010_v20 = vld [vmem:[%s4176_s0 + $0xa4] ss:$16 sps:$4 sm:$0xff]  }
   0x8   :  { %445 = vmatprep.subr.bf16.mxu0 %v2992_v8  ;;  %486 = vmatprep.subr.bf16.mxu1 %v2994_v9  ;;  %v3012_v21 = vld [vmem:[%s4176_s0 + $0xac] ss:$16 sps:$4 sm:$0xff]   ;;  %v3014_v22 = vld [vmem:[%s4176_s0 + $0xa0] ss:$16 sps:$4 sm:$0xff]   ;;  %v3015_v23 = vld [vmem:[%s4176_s0 + $0xa8] ss:$16 sps:$4 sm:$0xff]  }
   0x9   :  { %v3016_v24 = vld [vmem:[%s4176_s0 + $0xc4] ss:$16 sps:$4 sm:$0xff]   ;;  %v3018_v25 = vld [vmem:[%s4176_s0 + $0xcc] ss:$16 sps:$4 sm:$0xff]   ;;  %v3020_v26 = vld [vmem:[%s4176_s0 + $0xc0] ss:$16 sps:$4 sm:$0xff]  }
   0xa   :  { %v3021_v27 = vld [vmem:[%s4176_s0 + $0xc8] ss:$16 sps:$4 sm:$0xff]   ;;  %v3022_v28 = vld [vmem:[%s4176_s0 + $0xe4] ss:$16 sps:$4 sm:$0xff]   ;;  %v3024_v29 = vld [vmem:[%s4176_s0 + $0xec] ss:$16 sps:$4 sm:$0xff]  }
   0xb   :  { %446 = vmatpush1.bf16.msra.mxu0 %v2996_v10  ;;  %487 = vmatpush1.bf16.msra.mxu1 %v2997_v11  ;;  %v3026_v30 = vld [vmem:[%s4176_s0 + $0xe0] ss:$16 sps:$4 sm:$0xff]   ;;  %v3027_v31 = vld [vmem:[%s4176_s0 + $0xe8] ss:$16 sps:$4 sm:$0xff]   ;;  %v3028_v32 = vld [vmem:[%s4176_s0 + $0x104] ss:$16 sps:$4 sm:$0xff]  }
   0xc   :  { %447 = vmatprep.subr.bf16.mxu0 %v2998_v12  ;;  %488 = vmatprep.subr.bf16.mxu1 %v3000_v13  ;;  %v3030_v33 = vld [vmem:[%s4176_s0 + $0x10c] ss:$16 sps:$4 sm:$0xff]   ;;  %v3032_v34 = vld [vmem:[%s4176_s0 + $0x100] ss:$16 sps:$4 sm:$0xff]   ;;  %v3033_v35 = vld [vmem:[%s4176_s0 + $0x108] ss:$16 sps:$4 sm:$0xff]  }
   0xd   :  { %v3034_v36 = vld [vmem:[%s4176_s0 + $0x124] ss:$16 sps:$4 sm:$0xff]   ;;  %v3036_v37 = vld [vmem:[%s4176_s0 + $0x12c] ss:$16 sps:$4 sm:$0xff]   ;;  %v3038_v38 = vld [vmem:[%s4176_s0 + $0x120] ss:$16 sps:$4 sm:$0xff]  }
   0xe   :  { %v3039_v39 = vld [vmem:[%s4176_s0 + $0x128] ss:$16 sps:$4 sm:$0xff]   ;;  %v3040_v40 = vld [vmem:[%s4176_s0 + $0x144] ss:$16 sps:$4 sm:$0xff]   ;;  %v3042_v41 = vld [vmem:[%s4176_s0 + $0x14c] ss:$16 sps:$4 sm:$0xff]  }
   0xf   :  { %448 = vmatpush1.bf16.msra.mxu0 %v3002_v14  ;;  %489 = vmatpush1.bf16.msra.mxu1 %v3003_v15  ;;  %v3044_v42 = vld [vmem:[%s4176_s0 + $0x140] ss:$16 sps:$4 sm:$0xff]   ;;  %v3045_v43 = vld [vmem:[%s4176_s0 + $0x148] ss:$16 sps:$4 sm:$0xff]   ;;  %v3046_v44 = vld [vmem:[%s4176_s0 + $0x164] ss:$16 sps:$4 sm:$0xff]  }
  0x10   :  { %449 = vmatprep.subr.bf16.mxu0 %v3004_v16  ;;  %490 = vmatprep.subr.bf16.mxu1 %v3006_v17  ;;  %v3048_v45 = vld [vmem:[%s4176_s0 + $0x16c] ss:$16 sps:$4 sm:$0xff]   ;;  %v3050_v46 = vld [vmem:[%s4176_s0 + $0x160] ss:$16 sps:$4 sm:$0xff]   ;;  %v3051_v47 = vld [vmem:[%s4176_s0 + $0x168] ss:$16 sps:$4 sm:$0xff]  }
  0x11   :  { %v3074_v48 = vld [vmem:[%s4176_s0 + $0x1e0] ss:$16 sps:$4 sm:$0x1f]   ;;  %v3075_v49 = vld [vmem:[%s4176_s0 + $0x1e8] ss:$16 sps:$4 sm:$0x1f]  }
  0x12   :  { %v3052_v50 = vld [vmem:[%s4176_s0 + $0x184] ss:$16 sps:$4 sm:$0xff]   ;;  %v3054_v51 = vld [vmem:[%s4176_s0 + $0x18c] ss:$16 sps:$4 sm:$0xff]   ;;  %v430_v53 = vsel %vm428_vm0, %v3074_v48, 0  ;;  %v436_v54 = vsel %vm428_vm0, %v3075_v49, 0 }
  0x13   :  { %450 = vmatpush1.bf16.msra.mxu0 %v3008_v18  ;;  %491 = vmatpush1.bf16.msra.mxu1 %v3009_v19  ;;  %v37_v52 = vld [vmem:[%s4177_s1] sm:$0x77]  ;;  %v3057_v57 = vld [vmem:[%s4176_s0 + $0x188] ss:$16 sps:$4 sm:$0xff]   ;;  %v3060_v59 = vld [vmem:[%s4176_s0 + $0x1ac] ss:$16 sps:$4 sm:$0xff]  }
  0x14   :  { %451 = vmatprep.subr.bf16.mxu0 %v3010_v20  ;;  %492 = vmatprep.subr.bf16.mxu1 %v3012_v21  ;;  %v2560_v55 = vcombine.high %v37_v52, %v37_v52  ;;  %v3056_v56 = vld [vmem:[%s4176_s0 + $0x180] ss:$16 sps:$4 sm:$0xff]   ;;  %v3058_v58 = vld [vmem:[%s4176_s0 + $0x1a4] ss:$16 sps:$4 sm:$0xff]   ;;  %v3063_v61 = vld [vmem:[%s4176_s0 + $0x1a8] ss:$16 sps:$4 sm:$0xff]   ;;  %v2559_v4 = vcombine.low %v37_v52, %v37_v52 }
  0x15   :  { %v3062_v60 = vld [vmem:[%s4176_s0 + $0x1a0] ss:$16 sps:$4 sm:$0xff]   ;;  %v3064_v62 = vld [vmem:[%s4176_s0 + $0x1c4] ss:$16 sps:$4 sm:$0xff]   ;;  %v3066_v63 = vld [vmem:[%s4176_s0 + $0x1cc] ss:$16 sps:$4 sm:$0xff]  }
  0x16   :  { %2626 = vmatprep.mubr.msk.bf16.mxu0 %vm424_vm1, %v2560_v55  ;;  %2628 = vmatprep.mubr.msk.bf16.mxu1 %vm424_vm1, %v2560_v55  ;;  %v3068_v0 = vld [vmem:[%s4176_s0 + $0x1c0] ss:$16 sps:$4 sm:$0xff]   ;;  %v3069_v1 = vld [vmem:[%s4176_s0 + $0x1c8] ss:$16 sps:$4 sm:$0xff]  }
  0x17   :  { %452 = vmatpush1.bf16.msra.mxu0 %v3014_v22  ;;  %493 = vmatpush1.bf16.msra.mxu1 %v3015_v23  ;;  %v3070_v2 = vld [vmem:[%s4176_s0 + $0x1e4] ss:$16 sps:$4 sm:$0x1f]   ;;  %v3072_v3 = vld [vmem:[%s4176_s0 + $0x1ec] ss:$16 sps:$4 sm:$0x1f]  }
  0x18   :  { %453 = vmatprep.subr.bf16.mxu0 %v3016_v24  ;;  %494 = vmatprep.subr.bf16.mxu1 %v3018_v25 }
  0x1b   :  { %454 = vmatpush1.bf16.msra.mxu0 %v3020_v26  ;;  %495 = vmatpush1.bf16.msra.mxu1 %v3021_v27 }
  0x1c   :  { %455 = vmatprep.subr.bf16.mxu0 %v3022_v28  ;;  %496 = vmatprep.subr.bf16.mxu1 %v3024_v29 }
  0x1f   :  { %456 = vmatpush1.bf16.msra.mxu0 %v3026_v30  ;;  %497 = vmatpush1.bf16.msra.mxu1 %v3027_v31 }
  0x20   :  { %457 = vmatprep.subr.bf16.mxu0 %v3028_v32  ;;  %498 = vmatprep.subr.bf16.mxu1 %v3030_v33 }
  0x23   :  { %458 = vmatpush1.bf16.msra.mxu0 %v3032_v34  ;;  %499 = vmatpush1.bf16.msra.mxu1 %v3033_v35 }
  0x24   :  { %459 = vmatprep.subr.bf16.mxu0 %v3034_v36  ;;  %500 = vmatprep.subr.bf16.mxu1 %v3036_v37 }
  0x27   :  { %460 = vmatpush1.bf16.msra.mxu0 %v3038_v38  ;;  %501 = vmatpush1.bf16.msra.mxu1 %v3039_v39 }
  0x28   :  { %461 = vmatprep.subr.bf16.mxu0 %v3040_v40  ;;  %502 = vmatprep.subr.bf16.mxu1 %v3042_v41 }
  0x2b   :  { %462 = vmatpush1.bf16.msra.mxu0 %v3044_v42  ;;  %503 = vmatpush1.bf16.msra.mxu1 %v3045_v43 }
  0x2c   :  { %463 = vmatprep.subr.bf16.mxu0 %v3046_v44  ;;  %504 = vmatprep.subr.bf16.mxu1 %v3048_v45 }
  0x2f   :  { %464 = vmatpush1.bf16.msra.mxu0 %v3050_v46  ;;  %505 = vmatpush1.bf16.msra.mxu1 %v3051_v47 }
  0x30   :  { %465 = vmatprep.subr.bf16.mxu0 %v3052_v50  ;;  %506 = vmatprep.subr.bf16.mxu1 %v3054_v51 }
  0x33   :  { %466 = vmatpush1.bf16.msra.mxu0 %v3056_v56  ;;  %507 = vmatpush1.bf16.msra.mxu1 %v3057_v57 }
  0x34   :  { %467 = vmatprep.subr.bf16.mxu0 %v3058_v58  ;;  %508 = vmatprep.subr.bf16.mxu1 %v3060_v59 }
  0x37   :  { %468 = vmatpush1.bf16.msra.mxu0 %v3062_v60  ;;  %509 = vmatpush1.bf16.msra.mxu1 %v3063_v61 }
  0x38   :  { %469 = vmatprep.subr.bf16.mxu0 %v3064_v62  ;;  %510 = vmatprep.subr.bf16.mxu1 %v3066_v63 }
  0x3b   :  { %470 = vmatpush1.bf16.msra.mxu0 %v3068_v0  ;;  %511 = vmatpush1.bf16.msra.mxu1 %v3069_v1 }
  0x3c   :  { %2625 = vmatprep.subr.msk.bf16.mxu0 %vm428_vm0, %v3070_v2  ;;  %2627 = vmatprep.subr.msk.bf16.mxu1 %vm428_vm0, %v3072_v3 }
  0x3f   :  { %472 = vmatpush1.bf16.msra.mxu0 %v430_v53  ;;  %513 = vmatpush1.bf16.msra.mxu1 %v436_v54 }
  0x42   :  { %474 = vmatmul.mubr.bf16.vlgmr.msra.gmra.mrb[0].mxu0 %v2559_v4  ;;  %515 = vmatmul.mubr.bf16.vlgmr.msra.gmra.mrb[0].mxu1 %v2559_v4 }
  0x43   :  { %15 = vsyncpa [#allocation4], 0  ;;  %vm528_vm2 = vcmask 61440   ;;  %v3176_v31 = vmov 0   ;;  %v548_v39 = vld [vmem:[%s4178_s2] sm:$0x1f] }
  0x44   :  { %2963 = vset.pattern.permute.xlu1 %v3176_v31  ;;  %610 = vst [vmem:[#allocation2] sm:$0x3] %v3176_v31  ;;  %2979 = vset.pattern.permute.xlu0 %v3176_v31  ;;  %v554_v42 = vld [vmem:[%s4179_s3] sm:$0x1f]  ;;  %s3177_s2 = smov 30   ;;  %vm585_vm3 = vcmask 244736  }
  0x45   :  { %s3178_s3 = smov 60   ;;  %vm606_vm4 = vcmask 490496   ;;  %vm612_vm5 = vcmask 393216   ;;  %vm613_vm6 = vsmask.f32 256  ;;  %v748_v31 = vld [vmem:[%s4180_s4 + $0x60] sm:$0xff] }
  0x46   :  { %vm3477_vm7 = vmand %vm612_vm5, %vm613_vm6  ;;  %s3180_s28 = smov 68   ;;  %s3181_s29 = smov 49   ;;  %vm641_vm8 = vcmask 795016   ;;  %vm660_vm10 = vcmask 1041168   ;;  %vm662_vm11 = vcmask 148481   ;;  %vm657_vm15 = vcmask 801792  }
  0x47   :  { %s3182_s20 = smov 19   ;;  %s3183_s21 = smov 98   ;;  %vm642_vm9 = vmand %vm641_vm8, %vm613_vm6  ;;  %vm663_vm12 = vsmask.f32 1280  ;;  %vm677_vm1 = vcmask 549016  }
  0x48   :  { %s3184_s15 = smov 79   ;;  %vm661_vm13 = vmand %vm660_vm10, %vm613_vm6 }
  0x49   :  { %vm664_vm14 = vmand %vm662_vm11, %vm663_vm12 }
 0x115   :  { %v475_v5 = vpop.f32.mrb[0].mxu0  ;;  %v516_v6 = vpop.f32.mrb[0].mxu1 }
 0x116   :  { %v523_v7 = vsel %vm428_vm0, %v475_v5, 0.0  ;;  %v534_v8 = vmul.f32 %v475_v5, %v475_v5  ;;  %v536_v9 = vmul.f32 %v516_v6, %v516_v6  ;;  %v477_v10 = vpop.f32.mrb[1].mxu0  ;;  %v518_v11 = vpop.f32.mrb[1].mxu1  ;;  %v526_v16 = vsel %vm428_vm0, %v516_v6, 0.0 }
 0x117   :  { %v524_v12 = vsel %vm428_vm0, %v477_v10, 0.0  ;;  %v535_v13 = vmul.f32 %v477_v10, %v477_v10  ;;  %v479_v14 = vpop.f32.mrb[2].mxu0  ;;  %v520_v15 = vpop.f32.mrb[2].mxu1  ;;  %v537_v22 = vmul.f32 %v518_v11, %v518_v11  ;;  %v529_v26 = vsel %vm528_vm2, %v518_v11, 0.0 }
 0x118   :  { %v538_v17 = vsel %vm428_vm0, %v534_v8, 0.0  ;;  %v480_v18 = vpop.f32.mrb[3].mxu0  ;;  %v521_v19 = vpop.f32.mrb[3].mxu1  ;;  %v525_v20 = vadd.f32 %v524_v12, %v523_v7  ;;  %v541_v23 = vsel %vm428_vm0, %v536_v9, 0.0  ;;  %v3179_v7 = vmov 1966171168  }
 0x119   :  { %v539_v21 = vsel %vm428_vm0, %v535_v13, 0.0  ;;  %v543_v29 = vsel %vm528_vm2, %v537_v22, 0.0  ;;  %v620_v8 = vunpack.c.l.s4 %v3179_v7  ;;  %v622_v9 = vlaneseq  ;;  %v741_v22 = vld [vmem:[%s4180_s4 + $0x28] sm:$0xff]  ;;  %vm665_vm0 = vmor %vm664_vm14, %vm661_vm13 }
 0x11a   :  { %v527_v24 = vadd.f32 %v526_v16, %v525_v20  ;;  %v540_v25 = vadd.f32 %v539_v21, %v538_v17  ;;  %v736_v16 = vld [vmem:[%s4180_s4] sm:$0xff]  ;;  %v737_v21 = vld [vmem:[%s4180_s4 + $0x8] sm:$0xff]  ;;  %vm696_vm2 = vsmask.f32 7938 }
 0x11b   :  { %v621_v12 = vunpack.c.0.s8 %v620_v8  ;;  %v3458_v13 = vshrl.u32 %v622_v9, 7  ;;  %v740_v17 = vld [vmem:[%s4180_s4 + $0x20] sm:$0xff]  ;;  %vm701_vm12 = vmand %vm641_vm8, %vm696_vm2 }
 0x11c   :  { %v530_v27 = vadd.f32 %v529_v26, %v527_v24  ;;  %v542_v28 = vadd.f32 %v541_v23, %v540_v25  ;;  %v2632_v19 = vcombine.low %v736_v16, %v740_v17  ;;  %v2633_v20 = vcombine.high %v736_v16, %v740_v17  ;;  %v776_v8 = vld [vmem:[%s4180_s4 + $0x140] sm:$0xff]  ;;  %vm713_vm13 = vmand %vm660_vm10, %vm696_vm2 }
 0x11d   :  { %v2634_v24 = vcombine.low %v737_v21, %v741_v22  ;;  %v2635_v25 = vcombine.high %v737_v21, %v741_v22  ;;  %v780_v9 = vld [vmem:[%s4180_s4 + $0x160] sm:$0xff]  ;;  %v789_v22 = vld [vmem:[%s4180_s4 + $0x1a8] sm:$0xff]  ;;  %vm721_vm8 = vmand %vm677_vm1, %vm696_vm2  ;;  %vm3186_vm10 = vmmov 0  }
 0x11e   :  { %531 = vadd.xlane.f32.xlu0 %v530_v27  ;;  %v544_v30 = vadd.f32 %v543_v29, %v542_v28  ;;  %v3473_v27 = vsub.s32 %v621_v12, %v3458_v13  ;;  %1571 = vmatprep.subr.bf16.mxu0 %v2633_v20  ;;  %v615_v29 = vld [vmem:[#allocation2] sm:$0x1]  ;;  %v781_v12 = vld [vmem:[%s4180_s4 + $0x168] sm:$0xff] }
 0x11f   :  { %1612 = vmatprep.subr.bf16.mxu1 %v2635_v25  ;;  %1572 = vmatpush1.bf16.msra.mxu0 %v2632_v19  ;;  %v788_v19 = vld [vmem:[%s4180_s4 + $0x1a0] sm:$0xff]  ;;  %v785_v20 = vld [vmem:[%s4180_s4 + $0x188] sm:$0xff] }
 0x120   :  { %1613 = vmatpush1.bf16.msra.mxu1 %v2634_v24  ;;  %v2682_v24 = vcombine.low %v785_v20, %v789_v22  ;;  %v2683_v25 = vcombine.high %v785_v20, %v789_v22  ;;  %v792_v28 = vld [vmem:[%s4180_s4 + $0x1c0] sm:$0xff] }
 0x121   :  { %v848_v22 = vld [vmem:[%s4180_s4 + $0x380] sm:$0xff] }
 0x122   :  { %545 = vadd.xlane.f32.xlu0 %v544_v30  ;;  %v744_v30 = vld [vmem:[%s4180_s4 + $0x40] sm:$0xff] }
 0x1ab   :  { %v532_v32 = vpop.xlane.xlu0 %531 }
 0x1ac   :  { %v533_v33 = vmul.f32 0.0025510204, %v532_v32 }
 0x1ae   :  { %v549_v35 = vmul.f32 %v533_v33, %v533_v33 }
 0x1af   :  { %v546_v34 = vpop.xlane.xlu0 %545 }
 0x1b0   :  { %v547_v36 = vmul.f32 0.0025510204, %v546_v34  ;;  %v745_v34 = vld [vmem:[%s4180_s4 + $0x48] sm:$0xff] }
 0x1b2   :  { %v550_v37 = vsub.f32 %v547_v36, %v549_v35  ;;  %v749_v35 = vld [vmem:[%s4180_s4 + $0x68] sm:$0xff]  ;;  %v2640_v36 = vcombine.low %v744_v30, %v748_v31 }
 0x1b4   :  { %v551_v38 = vadd.f32 1e-05, %v550_v37  ;;  %v2642_v37 = vcombine.low %v745_v34, %v749_v35 }
 0x1b6   :  { %3150 = vrsqrt.f32 %v551_v38  ;;  %v2643_v38 = vcombine.high %v745_v34, %v749_v35 }
 0x1b8   :  { %1614 = vmatprep.subr.bf16.mxu1 %v2643_v38  ;;  %v804_v38 = vld [vmem:[%s4180_s4 + $0x220] sm:$0xff] }
 0x1b9   :  { %1615 = vmatpush1.bf16.msra.mxu1 %v2642_v37  ;;  %v800_v37 = vld [vmem:[%s4180_s4 + $0x200] sm:$0xff] }
 0x1c0   :  { %v3151_v40 = vpop.eup %3150 }
 0x1c1   :  { %v553_v41 = vmul.f32 %v3151_v40, %v548_v39 }
 0x1c3   :  { %559 = vperm.xlu1 %2963, %v553_v41   ;;  %v555_v43 = vmul.f32 %v553_v41, %v533_v33  ;;  %v2641_v33 = vcombine.high %v744_v30, %v748_v31  ;;  %v752_v41 = vld [vmem:[%s4180_s4 + $0x80] sm:$0xff]  ;;  %v793_v31 = vld [vmem:[%s4180_s4 + $0x1c8] sm:$0xff] }
 0x1c5   :  { %v556_v44 = vsub.f32 %v554_v42, %v555_v43  ;;  %1573 = vmatprep.subr.bf16.mxu0 %v2641_v33  ;;  %v756_v42 = vld [vmem:[%s4180_s4 + $0xa0] sm:$0xff]  ;;  %v753_v43 = vld [vmem:[%s4180_s4 + $0x88] sm:$0xff] }
 0x1c6   :  { %1574 = vmatpush1.bf16.msra.mxu0 %v2640_v36  ;;  %v797_v33 = vld [vmem:[%s4180_s4 + $0x1e8] sm:$0xff] }
 0x1c7   :  { %568 = vperm.xlu1 %2963, %v556_v44   ;;  %v2690_v35 = vcombine.low %v793_v31, %v797_v33  ;;  %v2691_v36 = vcombine.high %v793_v31, %v797_v33 }
 0x242   :  { %v560_v45 = vpop.permute.xlu1 %559 }
 0x243   :  { %v562_v46 = vmul.f32 %v560_v45, %v475_v5  ;;  %v563_v47 = vmul.f32 %v560_v45, %v477_v10  ;;  %v564_v48 = vmul.f32 %v560_v45, %v516_v6  ;;  %v565_v49 = vmul.f32 %v560_v45, %v518_v11 }
 0x244   :  { %v2649_v45 = vcombine.high %v752_v41, %v756_v42 }
 0x246   :  { %v569_v50 = vpop.permute.xlu1 %568  ;;  %1575 = vmatprep.subr.bf16.mxu0 %v2649_v45  ;;  %v808_v45 = vld [vmem:[%s4180_s4 + $0x240] sm:$0xff] }
 0x247   :  { %v571_v51 = vadd.f32 %v569_v50, %v562_v46  ;;  %v572_v52 = vadd.f32 %v569_v50, %v563_v47  ;;  %v573_v53 = vadd.f32 %v569_v50, %v564_v48  ;;  %v574_v54 = vadd.f32 %v569_v50, %v565_v49  ;;  %v757_v46 = vld [vmem:[%s4180_s4 + $0xa8] sm:$0xff] }
 0x248   :  { %v2648_v47 = vcombine.low %v752_v41, %v756_v42  ;;  %v2650_v48 = vcombine.low %v753_v43, %v757_v46  ;;  %v2651_v49 = vcombine.high %v753_v43, %v757_v46  ;;  %v805_v41 = vld [vmem:[%s4180_s4 + $0x228] sm:$0xff]  ;;  %v2696_v42 = vcombine.low %v800_v37, %v804_v38  ;;  %v812_v46 = vld [vmem:[%s4180_s4 + $0x260] sm:$0xff] }
 0x249   :  { %v577_v55 = vmax.f32 %v573_v53, 0.0  ;;  %v578_v56 = vmax.f32 %v574_v54, 0.0  ;;  %v575_v57 = vmax.f32 %v571_v51, 0.0  ;;  %v576_v58 = vmax.f32 %v572_v52, 0.0  ;;  %v760_v53 = vld [vmem:[%s4180_s4 + $0xc0] sm:$0xff] }
 0x24a   :  { %1616 = vmatprep.subr.bf16.mxu1 %v2651_v49  ;;  %1576 = vmatpush1.bf16.msra.mxu0 %v2648_v47  ;;  %v764_v54 = vld [vmem:[%s4180_s4 + $0xe0] sm:$0xff]  ;;  %v809_v47 = vld [vmem:[%s4180_s4 + $0x248] sm:$0xff] }
 0x24b   :  { %v2964_v59 = vpack.i.bf16 %v578_v56, %v577_v55  ;;  %v2969_v60 = vpack.i.bf16 %v576_v58, %v575_v57  ;;  %v761_v56 = vld [vmem:[%s4180_s4 + $0xc8] sm:$0xff]  ;;  %1617 = vmatpush1.bf16.msra.mxu1 %v2650_v48  ;;  %v2705_v48 = vcombine.high %v808_v45, %v812_v46 }
 0x24c   :  { %v813_v49 = vld [vmem:[%s4180_s4 + $0x268] sm:$0xff] }
 0x24d   :  { %2965 = vrot.lane.b32.xlu0 %v2964_v59, %s3177_s2  ;;  %2970 = vrot.lane.b32.xlu1 %v2969_v60, %s3177_s2 }
 0x2bf   :  { %v2966_v61 = vpop.permute.xlu0 %2965  ;;  %v2971_v4 = vpop.permute.xlu1 %2970 }
 0x2c0   :  { %v2968_v62 = vunpack.i.h.bf16 %v2966_v61  ;;  %v2967_v63 = vunpack.i.l.bf16 %v2966_v61  ;;  %v2973_v5 = vunpack.i.h.bf16 %v2971_v4  ;;  %v2972_v6 = vunpack.i.l.bf16 %v2971_v4 }
 0x2c2   :  { %v595_v0 = vsel %vm585_vm3, %v2967_v63, %v2968_v62  ;;  %v598_v1 = vmax.f32 %v576_v58, %v2967_v63  ;;  %v586_v10 = vsel %vm585_vm3, %v2972_v6, %v2973_v5  ;;  %v2656_v58 = vcombine.low %v760_v53, %v764_v54  ;;  %v768_v63 = vld [vmem:[%s4180_s4 + $0x100] sm:$0xff]  ;;  %vm678_vm3 = vmand %vm677_vm1, %vm613_vm6 }
 0x2c3   :  { %v599_v2 = vmax.f32 %v577_v55, %v595_v0  ;;  %v588_v18 = vmax.f32 %v575_v57, %v586_v10  ;;  %v2657_v55 = vcombine.high %v760_v53, %v764_v54  ;;  %v765_v57 = vld [vmem:[%s4180_s4 + $0xe8] sm:$0xff]  ;;  %v772_v0 = vld [vmem:[%s4180_s4 + $0x120] sm:$0xff] }
 0x2c4   :  { %v2658_v59 = vcombine.low %v761_v56, %v765_v57  ;;  %v2659_v60 = vcombine.high %v761_v56, %v765_v57  ;;  %v2664_v4 = vcombine.low %v768_v63, %v772_v0  ;;  %v777_v10 = vld [vmem:[%s4180_s4 + $0x148] sm:$0xff]  ;;  %v816_v53 = vld [vmem:[%s4180_s4 + $0x280] sm:$0xff] }
 0x2c5   :  { %v2974_v3 = vpack.i.bf16 %v599_v2, %v598_v1  ;;  %1577 = vmatprep.subr.bf16.mxu0 %v2657_v55  ;;  %v769_v1 = vld [vmem:[%s4180_s4 + $0x108] sm:$0xff]  ;;  %v2665_v2 = vcombine.high %v768_v63, %v772_v0  ;;  %v2675_v16 = vcombine.high %v777_v10, %v781_v12  ;;  %v820_v54 = vld [vmem:[%s4180_s4 + $0x2a0] sm:$0xff] }
 0x2c6   :  { %1618 = vmatprep.subr.bf16.mxu1 %v2659_v60  ;;  %1578 = vmatpush1.bf16.msra.mxu0 %v2656_v58  ;;  %v817_v55 = vld [vmem:[%s4180_s4 + $0x288] sm:$0xff]  ;;  %v2713_v56 = vcombine.high %v816_v53, %v820_v54  ;;  %v2712_v58 = vcombine.low %v816_v53, %v820_v54 }
 0x2c7   :  { %2975 = vrot.lane.b32.xlu1 %v2974_v3, %s3178_s3  ;;  %v773_v3 = vld [vmem:[%s4180_s4 + $0x128] sm:$0xff]  ;;  %1619 = vmatpush1.bf16.msra.mxu1 %v2658_v59 }
 0x2c8   :  { %v2666_v5 = vcombine.low %v769_v1, %v773_v3  ;;  %v2667_v6 = vcombine.high %v769_v1, %v773_v3  ;;  %1579 = vmatprep.subr.bf16.mxu0 %v2665_v2  ;;  %v821_v57 = vld [vmem:[%s4180_s4 + $0x2a8] sm:$0xff] }
 0x2c9   :  { %v2714_v59 = vcombine.low %v817_v55, %v821_v57  ;;  %v2715_v60 = vcombine.high %v817_v55, %v821_v57  ;;  %v825_v63 = vld [vmem:[%s4180_s4 + $0x2c8] sm:$0xff] }
 0x2ca   :  { %1620 = vmatprep.subr.bf16.mxu1 %v2667_v6  ;;  %1580 = vmatpush1.bf16.msra.mxu0 %v2664_v4  ;;  %v829_v1 = vld [vmem:[%s4180_s4 + $0x2e8] sm:$0xff]  ;;  %v836_v6 = vld [vmem:[%s4180_s4 + $0x320] sm:$0xff] }
 0x2cb   :  { %1621 = vmatpush1.bf16.msra.mxu1 %v2666_v5  ;;  %v2722_v3 = vcombine.low %v825_v63, %v829_v1  ;;  %v2723_v4 = vcombine.high %v825_v63, %v829_v1  ;;  %v832_v5 = vld [vmem:[%s4180_s4 + $0x300] sm:$0xff] }
 0x2cc   :  { %1622 = vmatprep.subr.bf16.mxu1 %v2675_v16  ;;  %v841_v16 = vld [vmem:[%s4180_s4 + $0x348] sm:$0xff] }
 0x339   :  { %v2976_v11 = vpop.permute.xlu1 %2975 }
 0x33a   :  { %v2978_v14 = vunpack.i.h.bf16 %v2976_v11  ;;  %v2977_v15 = vunpack.i.l.bf16 %v2976_v11  ;;  %v2673_v11 = vcombine.high %v776_v8, %v780_v9 }
 0x33c   :  { %v607_v23 = vsel %vm606_vm4, %v2977_v15, %v2978_v14  ;;  %v2672_v14 = vcombine.low %v776_v8, %v780_v9  ;;  %v2674_v15 = vcombine.low %v777_v10, %v781_v12  ;;  %1581 = vmatprep.subr.bf16.mxu0 %v2673_v11  ;;  %v2729_v8 = vcombine.high %v832_v5, %v836_v6  ;;  %v837_v9 = vld [vmem:[%s4180_s4 + $0x328] sm:$0xff]  ;;  %vm697_vm4 = vmand %vm612_vm5, %vm696_vm2 }
 0x33d   :  { %v609_v26 = vmax.f32 %v588_v18, %v607_v23  ;;  %v784_v18 = vld [vmem:[%s4180_s4 + $0x180] sm:$0xff]  ;;  %v2728_v10 = vcombine.low %v832_v5, %v836_v6  ;;  %vm714_vm5 = vsmask.f32 7942 }
 0x33e   :  { %1582 = vmatpush1.bf16.msra.mxu0 %v2672_v14  ;;  %v2681_v21 = vcombine.high %v784_v18, %v788_v19  ;;  %1623 = vmatpush1.bf16.msra.mxu1 %v2674_v15  ;;  %v2680_v23 = vcombine.low %v784_v18, %v788_v19  ;;  %v840_v14 = vld [vmem:[%s4180_s4 + $0x340] sm:$0xff]  ;;  %v845_v18 = vld [vmem:[%s4180_s4 + $0x368] sm:$0xff]  ;;  %vm715_vm14 = vmand %vm662_vm11, %vm714_vm5  ;;  %vm2543_vm11 = vcmask 74752  }
 0x33f   :  { %v3487_v32 = vpack.c.bf16 %v609_v26, %v609_v26  ;;  %1624 = vmatprep.subr.bf16.mxu1 %v2683_v25  ;;  %v844_v15 = vld [vmem:[%s4180_s4 + $0x360] sm:$0xff]  ;;  %v2738_v20 = vcombine.low %v841_v16, %v845_v18 }
 0x340   :  { %1583 = vmatprep.subr.bf16.mxu0 %v2681_v21  ;;  %v2736_v19 = vcombine.low %v840_v14, %v844_v15  ;;  %v2739_v21 = vcombine.high %v841_v16, %v845_v18  ;;  %v750_v16 = vld [vmem:[%s4180_s4 + $0x70] sm:$0xff]  ;;  %v751_v18 = vld [vmem:[%s4180_s4 + $0x78] sm:$0xff] }
 0x341   :  { %v625_v39 = vrot.slane %v3487_v32, %v3473_v27  ;;  %v616_v40 = vsel %vm3477_vm7, %v3487_v32, %v615_v29  ;;  %v796_v29 = vld [vmem:[%s4180_s4 + $0x1e0] sm:$0xff]  ;;  %vm686_vm7 = vcmask 950816  }
 0x342   :  { %617 = vst [vmem:[#allocation2] sm:$0x1] %v616_v40  ;;  %1584 = vmatpush1.bf16.msra.mxu0 %v2680_v23  ;;  %v2689_v30 = vcombine.high %v792_v28, %v796_v29  ;;  %1625 = vmatpush1.bf16.msra.mxu1 %v2682_v24  ;;  %v2688_v34 = vcombine.low %v792_v28, %v796_v29  ;;  %v852_v23 = vld [vmem:[%s4180_s4 + $0x3a0] sm:$0xff]  ;;  %v849_v24 = vld [vmem:[%s4180_s4 + $0x388] sm:$0xff] }
 0x343   :  { %v3510_v44 = vrot.slane %v625_v39, %v3473_v27  ;;  %v646_v52 = vcombine.high %v625_v39, %v625_v39  ;;  %1626 = vmatprep.subr.bf16.mxu1 %v2691_v36  ;;  %v801_v39 = vld [vmem:[%s4180_s4 + $0x208] sm:$0xff]  ;;  %v2697_v40 = vcombine.high %v800_v37, %v804_v38  ;;  %v2744_v25 = vcombine.low %v848_v22, %v852_v23  ;;  %v856_v29 = vld [vmem:[%s4180_s4 + $0x3c0] sm:$0xff] }
 0x344   :  { %1585 = vmatprep.subr.bf16.mxu0 %v2689_v30  ;;  %v2698_v43 = vcombine.low %v801_v39, %v805_v41  ;;  %v853_v28 = vld [vmem:[%s4180_s4 + $0x3a8] sm:$0xff]  ;;  %v860_v30 = vld [vmem:[%s4180_s4 + $0x3e0] sm:$0xff] }
 0x345   :  { %v682_v50 = vcombine.high %v3510_v44, %v3510_v44  ;;  %v634_v51 = vshrl.u32 %v3510_v44, 16  ;;  %v653_v62 = vrot.slane %v646_v52, %v3473_v27  ;;  %v691_v17 = vshll.u32 %v3510_v44, 16 }
 0x346   :  { %1586 = vmatpush1.bf16.msra.mxu0 %v2688_v34  ;;  %1627 = vmatpush1.bf16.msra.mxu1 %v2690_v35  ;;  %v2699_v44 = vcombine.high %v801_v39, %v805_v41  ;;  %v2707_v52 = vcombine.high %v809_v47, %v813_v49  ;;  %v2747_v31 = vcombine.high %v849_v24, %v853_v28  ;;  %v857_v34 = vld [vmem:[%s4180_s4 + $0x3c8] sm:$0xff]  ;;  %v3686_v41 = vld [vmem:[%s4180_s4 + $0x30] sm:$0xff] }
 0x347   :  { %683 = vrot.lane.b32.xlu0 %v682_v50, %s3180_s28  ;;  %638 = vrot.lane.b32.xlu1 %v634_v51, %s3181_s29  ;;  %v726_v61 = vshll.u32 %v682_v50, 16  ;;  %v670_v7 = vshrl.u32 %v653_v62, 16  ;;  %v705_v26 = vshll.u32 %v653_v62, 16  ;;  %v2704_v50 = vcombine.low %v808_v45, %v812_v46  ;;  %v861_v35 = vld [vmem:[%s4180_s4 + $0x3e8] sm:$0xff] }
 0x348   :  { %1587 = vmatprep.subr.bf16.mxu0 %v2697_v40  ;;  %1628 = vmatprep.subr.bf16.mxu1 %v2699_v44  ;;  %v2706_v51 = vcombine.low %v809_v47, %v813_v49  ;;  %v2753_v33 = vcombine.high %v856_v29, %v860_v30  ;;  %v2746_v36 = vcombine.low %v849_v24, %v853_v28  ;;  %v3681_v40 = vld [vmem:[%s4180_s4 + $0x10] sm:$0xff]  ;;  %v3698_v44 = vld [vmem:[%s4180_s4 + $0x38] sm:$0xff] }
 0x349   :  { %v2755_v37 = vcombine.high %v857_v34, %v861_v35  ;;  %v2752_v38 = vcombine.low %v856_v29, %v860_v30  ;;  %v2754_v39 = vcombine.low %v857_v34, %v861_v35  ;;  %v2636_v45 = vcombine.low %v3681_v40, %v3686_v41  ;;  %v643_v49 = vld [vmem:[#allocation2] sm:$0x1]  ;;  %v758_v24 = vld [vmem:[%s4180_s4 + $0xb0] sm:$0xff]  ;;  %v763_v34 = vld [vmem:[%s4180_s4 + $0xd8] sm:$0xff] }
 0x34a   :  { %1588 = vmatpush1.bf16.msra.mxu0 %v2696_v42  ;;  %1629 = vmatpush1.bf16.msra.mxu1 %v2698_v43  ;;  %v3691_v42 = vld [vmem:[%s4180_s4 + $0x18] sm:$0xff]  ;;  %v2637_v43 = vcombine.high %v3681_v40, %v3686_v41  ;;  %v770_v40 = vld [vmem:[%s4180_s4 + $0x110] sm:$0xff] }
 0x34b   :  { %728 = vrot.lane.b32.xlu0 %v726_v61, %s3182_s20  ;;  %654 = vrot.lane.b32.xlu1 %v653_v62, %s3183_s21  ;;  %v824_v61 = vld [vmem:[%s4180_s4 + $0x2c0] sm:$0xff]  ;;  %v2638_v46 = vcombine.low %v3691_v42, %v3698_v44  ;;  %v2639_v47 = vcombine.high %v3691_v42, %v3698_v44  ;;  %v767_v35 = vld [vmem:[%s4180_s4 + $0xf8] sm:$0xff] }
 0x34c   :  { %1589 = vmatprep.subr.bf16.mxu0 %v2705_v48  ;;  %1630 = vmatprep.subr.bf16.mxu1 %v2707_v52  ;;  %v828_v62 = vld [vmem:[%s4180_s4 + $0x2e0] sm:$0xff]  ;;  %v774_v41 = vld [vmem:[%s4180_s4 + $0x130] sm:$0xff]  ;;  %v771_v42 = vld [vmem:[%s4180_s4 + $0x118] sm:$0xff] }
 0x34d   :  { %v2721_v0 = vcombine.high %v824_v61, %v828_v62  ;;  %v2720_v2 = vcombine.low %v824_v61, %v828_v62 }
 0x34e   :  { %1590 = vmatpush1.bf16.msra.mxu0 %v2704_v50  ;;  %1631 = vmatpush1.bf16.msra.mxu1 %v2706_v51 }
 0x34f   :  { %674 = vrot.lane.b32.xlu1 %v670_v7, %s3182_s20  ;;  %1591 = vmatprep.subr.bf16.mxu0 %v2713_v56  ;;  %v833_v7 = vld [vmem:[%s4180_s4 + $0x308] sm:$0xff]  ;;  %s3187_s20 = smov [#allocation3]  }
 0x350   :  { %1632 = vmatprep.subr.bf16.mxu1 %v2715_v60  ;;  %v2730_v11 = vcombine.low %v833_v7, %v837_v9  ;;  %v2731_v12 = vcombine.high %v833_v7, %v837_v9 }
 0x352   :  { %1592 = vmatpush1.bf16.msra.mxu0 %v2712_v58  ;;  %1633 = vmatpush1.bf16.msra.mxu1 %v2714_v59 }
 0x353   :  { %693 = vrot.lane.b32.xlu1 %v691_v17, %s3184_s15  ;;  %1593 = vmatprep.subr.bf16.mxu0 %v2721_v0  ;;  %v2737_v17 = vcombine.high %v840_v14, %v844_v15  ;;  %v746_v15 = vld [vmem:[%s4180_s4 + $0x50] sm:$0xff] }
 0x354   :  { %1634 = vmatprep.subr.bf16.mxu1 %v2723_v4 }
 0x356   :  { %1594 = vmatpush1.bf16.msra.mxu0 %v2720_v2  ;;  %1635 = vmatpush1.bf16.msra.mxu1 %v2722_v3 }
 0x357   :  { %707 = vrot.lane.b32.xlu1 %v705_v26, %s3181_s29  ;;  %1595 = vmatprep.subr.bf16.mxu0 %v2729_v8  ;;  %v2745_v26 = vcombine.high %v848_v22, %v852_v23  ;;  %v2645_v22 = vcombine.high %v746_v15, %v750_v16 }
 0x358   :  { %1636 = vmatprep.subr.bf16.mxu1 %v2731_v12 }
 0x35a   :  { %1596 = vmatpush1.bf16.msra.mxu0 %v2728_v10  ;;  %1637 = vmatpush1.bf16.msra.mxu1 %v2730_v11 }
 0x35b   :  { %1597 = vmatprep.subr.bf16.mxu0 %v2737_v17  ;;  %1638 = vmatprep.subr.bf16.mxu1 %v2739_v21  ;;  %v747_v17 = vld [vmem:[%s4180_s4 + $0x58] sm:$0xff]  ;;  %v754_v21 = vld [vmem:[%s4180_s4 + $0x90] sm:$0xff] }
 0x35c   :  { %v2647_v23 = vcombine.high %v747_v17, %v751_v18  ;;  %v2646_v28 = vcombine.low %v747_v17, %v751_v18  ;;  %v2653_v29 = vcombine.high %v754_v21, %v758_v24  ;;  %v814_v17 = vld [vmem:[%s4180_s4 + $0x270] sm:$0xff]  ;;  %v811_v18 = vld [vmem:[%s4180_s4 + $0x258] sm:$0xff] }
 0x35e   :  { %1598 = vmatpush1.bf16.msra.mxu0 %v2736_v19  ;;  %1639 = vmatpush1.bf16.msra.mxu1 %v2738_v20 }
 0x35f   :  { %1599 = vmatprep.subr.bf16.mxu0 %v2745_v26  ;;  %1640 = vmatprep.subr.bf16.mxu1 %v2747_v31  ;;  %v2644_v26 = vcombine.low %v746_v15, %v750_v16  ;;  %v762_v31 = vld [vmem:[%s4180_s4 + $0xd0] sm:$0xff] }
 0x360   :  { %v810_v16 = vld [vmem:[%s4180_s4 + $0x250] sm:$0xff] }
 0x362   :  { %1600 = vmatpush1.bf16.msra.mxu0 %v2744_v25  ;;  %1641 = vmatpush1.bf16.msra.mxu1 %v2746_v36  ;;  %v755_v25 = vld [vmem:[%s4180_s4 + $0x98] sm:$0xff]  ;;  %v2652_v36 = vcombine.low %v754_v21, %v758_v24 }
 0x363   :  { %1601 = vmatprep.subr.bf16.mxu0 %v2753_v33  ;;  %1642 = vmatprep.subr.bf16.mxu1 %v2755_v37  ;;  %v766_v33 = vld [vmem:[%s4180_s4 + $0xf0] sm:$0xff] }
 0x364   :  { %v2660_v44 = vcombine.low %v762_v31, %v766_v33 }
 0x366   :  { %1602 = vmatpush1.bf16.msra.mxu0 %v2752_v38  ;;  %1643 = vmatpush1.bf16.msra.mxu1 %v2754_v39  ;;  %v2661_v38 = vcombine.high %v762_v31, %v766_v33  ;;  %v2663_v39 = vcombine.high %v763_v34, %v767_v35 }
 0x367   :  { %1653 = vmatprep.subr.bf16.mxu0 %v2637_v43  ;;  %1694 = vmatprep.subr.bf16.mxu1 %v2639_v47  ;;  %v775_v43 = vld [vmem:[%s4180_s4 + $0x138] sm:$0xff] }
 0x368   :  { %v2671_v47 = vcombine.high %v771_v42, %v775_v43 }
 0x3b9   :  { %v639_v48 = vpop.permute.xlu1 %638  ;;  %v684_v62 = vpop.permute.xlu0 %683 }
 0x3ba   :  { %v644_v50 = vsel %vm642_vm9, %v639_v48, %v643_v49  ;;  %vm687_vm9 = vmand %vm686_vm7, %vm613_vm6  ;;  %vm710_vm6 = vcmask 400384   ;;  %v778_v48 = vld [vmem:[%s4180_s4 + $0x150] sm:$0xff] }
 0x3bb   :  { %645 = vst [vmem:[#allocation2] sm:$0x1] %v644_v50  ;;  %v782_v49 = vld [vmem:[%s4180_s4 + $0x170] sm:$0xff]  ;;  %v779_v50 = vld [vmem:[%s4180_s4 + $0x158] sm:$0xff] }
 0x3bd   :  { %v655_v51 = vpop.permute.xlu1 %654  ;;  %v729_v9 = vpop.permute.xlu0 %728 }
 0x3be   :  { %v656_v52 = vrot.slane %v655_v51, 7 }
 0x3c0   :  { %v658_v53 = vsel %vm657_vm15, %v656_v52, %v655_v51  ;;  %vm716_vm15 = vmor %vm715_vm14, %vm713_vm13  ;;  %v2668_v52 = vcombine.low %v770_v40, %v774_v41 }
 0x3c1   :  { %v675_v56 = vpop.permute.xlu1 %674 }
 0x3c2   :  { %v666_v54 = vld [vmem:[#allocation2] sm:$0x3] }
 0x3c3   :  { %v667_v55 = vsel %vm665_vm0, %v658_v53, %v666_v54  ;;  %vm731_vm0 = vmand %vm686_vm7, %vm696_vm2  ;;  %v2670_v53 = vcombine.low %v771_v42, %v775_v43  ;;  %v2677_v54 = vcombine.high %v778_v48, %v782_v49  ;;  %v834_v42 = vld [vmem:[%s4180_s4 + $0x310] sm:$0xff] }
 0x3c4   :  { %668 = vst [vmem:[#allocation2] sm:$0x3] %v667_v55  ;;  %v838_v43 = vld [vmem:[%s4180_s4 + $0x330] sm:$0xff] }
 0x3c5   :  { %v694_v58 = vpop.permute.xlu1 %693 }
 0x3c9   :  { %v708_v3 = vpop.permute.xlu1 %707 }
 0x3ca   :  { %v709_v4 = vrot.slane %v708_v3, 7 }
 0x3cb   :  { %v679_v57 = vld [vmem:[#allocation2 + $0x1] sm:$0x1]  ;;  %v698_v59 = vld [vmem:[#allocation2] sm:$0x1] }
 0x3cc   :  { %v680_v60 = vsel %vm678_vm3, %v675_v56, %v679_v57  ;;  %v699_v61 = vsel %vm697_vm4, %v694_v58, %v698_v59  ;;  %v711_v5 = vsel %vm710_vm6, %v709_v4, %v708_v3  ;;  %v786_v56 = vld [vmem:[%s4180_s4 + $0x190] sm:$0xff]  ;;  %v787_v58 = vld [vmem:[%s4180_s4 + $0x198] sm:$0xff] }
 0x3cd   :  { %681 = vst [vmem:[#allocation2 + $0x1] sm:$0x1] %v680_v60  ;;  %700 = vst [vmem:[#allocation2] sm:$0x1] %v699_v61  ;;  %v790_v57 = vld [vmem:[%s4180_s4 + $0x1b0] sm:$0xff]  ;;  %v791_v59 = vld [vmem:[%s4180_s4 + $0x1b8] sm:$0xff]  ;;  %v2676_v60 = vcombine.low %v778_v48, %v782_v49  ;;  %v2733_v48 = vcombine.high %v834_v42, %v838_v43 }
 0x3ce   :  { %v799_v3 = vld [vmem:[%s4180_s4 + $0x1f8] sm:$0xff]  ;;  %v2684_v4 = vcombine.low %v786_v56, %v790_v57 }
 0x3d4   :  { %v688_v63 = vld [vmem:[#allocation2 + $0x1] sm:$0x1]  ;;  %v702_v0 = vld [vmem:[#allocation2] sm:$0x1] }
 0x3d5   :  { %v689_v1 = vsel %vm687_vm9, %v684_v62, %v688_v63  ;;  %v703_v2 = vsel %vm701_vm12, %v3487_v32, %v702_v0  ;;  %v2685_v62 = vcombine.high %v786_v56, %v790_v57  ;;  %v2687_v63 = vcombine.high %v787_v58, %v791_v59  ;;  %v794_v0 = vld [vmem:[%s4180_s4 + $0x1d0] sm:$0xff] }
 0x3d6   :  { %690 = vst [vmem:[#allocation2 + $0x1] sm:$0x1] %v689_v1  ;;  %704 = vst [vmem:[#allocation2] sm:$0x1] %v703_v2  ;;  %v798_v1 = vld [vmem:[%s4180_s4 + $0x1f0] sm:$0xff]  ;;  %v795_v2 = vld [vmem:[%s4180_s4 + $0x1d8] sm:$0xff] }
 0x3dd   :  { %v717_v6 = vld [vmem:[#allocation2] sm:$0x3] }
 0x3de   :  { %v718_v7 = vsel %vm716_vm15, %v711_v5, %v717_v6  ;;  %v2686_v5 = vcombine.low %v787_v58, %v791_v59  ;;  %v2693_v6 = vcombine.high %v794_v0, %v798_v1  ;;  %v850_v58 = vld [vmem:[%s4180_s4 + $0x390] sm:$0xff] }
 0x3df   :  { %719 = vst [vmem:[#allocation2] sm:$0x3] %v718_v7  ;;  %v2695_v7 = vcombine.high %v795_v2, %v799_v3  ;;  %v854_v59 = vld [vmem:[%s4180_s4 + $0x3b0] sm:$0xff] }
 0x3e6   :  { %v722_v32 = vld [vmem:[#allocation2 + $0x1] sm:$0x1] }
 0x3e7   :  { %v723_v8 = vsel %vm721_vm8, %v655_v51, %v722_v32  ;;  %v783_v51 = vld [vmem:[%s4180_s4 + $0x178] sm:$0xff]  ;;  %v802_v32 = vld [vmem:[%s4180_s4 + $0x210] sm:$0xff] }
 0x3e8   :  { %724 = vst [vmem:[#allocation2 + $0x1] sm:$0x1] %v723_v8  ;;  %v2679_v55 = vcombine.high %v779_v50, %v783_v51  ;;  %v2678_v61 = vcombine.low %v779_v50, %v783_v51  ;;  %v806_v8 = vld [vmem:[%s4180_s4 + $0x230] sm:$0xff] }
 0x3e9   :  { %v2700_v21 = vcombine.low %v802_v32, %v806_v8  ;;  %v842_v50 = vld [vmem:[%s4180_s4 + $0x350] sm:$0xff] }
 0x3ea   :  { %v846_v51 = vld [vmem:[%s4180_s4 + $0x370] sm:$0xff] }
 0x3eb   :  { %v2741_v56 = vcombine.high %v842_v50, %v846_v51 }
 0x3ef   :  { %v732_v10 = vld [vmem:[#allocation2 + $0x1] sm:$0x1] }
 0x3f0   :  { %v733_v11 = vsel %vm731_vm0, %v729_v9, %v732_v10  ;;  %v803_v9 = vld [vmem:[%s4180_s4 + $0x218] sm:$0xff] }
 0x3f1   :  { %734 = vst [vmem:[#allocation2 + $0x1] sm:$0x1] %v733_v11  ;;  %v807_v10 = vld [vmem:[%s4180_s4 + $0x238] sm:$0xff]  ;;  %v2692_v11 = vcombine.low %v794_v0, %v798_v1  ;;  %v2749_v0 = vcombine.high %v850_v58, %v854_v59 }
 0x3f2   :  { %v2703_v15 = vcombine.high %v803_v9, %v807_v10 }
 0x3f8   :  { %v2631_v12 = vld.sshfl [vmem:[#allocation2] sm:$0x11 pattern:$0x75316420] }
 0x3f9   :  { %v914_v14 = vcombine.high %v2631_v12, %v2631_v12  ;;  %v3741_v20 = vrot.slane %v2631_v12, %v3473_v27  ;;  %v2694_v12 = vcombine.low %v795_v2, %v799_v3  ;;  %v858_v2 = vld [vmem:[%s4180_s4 + $0x3d0] sm:$0xff] }
 0x3fa   :  { %v862_v3 = vld [vmem:[%s4180_s4 + $0x3f0] sm:$0xff] }
 0x3fb   :  { %v928_v19 = vrot.slane %v914_v14, %v3473_v27  ;;  %v759_v27 = vld [vmem:[%s4180_s4 + $0xb8] sm:$0xff]  ;;  %v2701_v14 = vcombine.high %v802_v32, %v806_v8  ;;  %v2757_v32 = vcombine.high %v858_v2, %v862_v3 }
 0x3fc   :  { %v2655_v30 = vcombine.high %v755_v25, %v759_v27  ;;  %v2654_v37 = vcombine.low %v755_v25, %v759_v27  ;;  %v818_v25 = vld [vmem:[%s4180_s4 + $0x290] sm:$0xff] }
 0x3fd   :  { %1603 = vmatprep.mubr.bf16.mxu0 %v928_v19  ;;  %1644 = vmatprep.mubr.bf16.mxu1 %v928_v19  ;;  %v822_v27 = vld [vmem:[%s4180_s4 + $0x2b0] sm:$0xff] }
 0x3fe   :  { %1604 = vmatmul.mubr.bf16.vlgmr.msra.gmra.mrb[4].mxu0 %v3741_v20  ;;  %1645 = vmatmul.mubr.bf16.vlgmr.msra.gmra.mrb[4].mxu1 %v3741_v20  ;;  %v2717_v31 = vcombine.high %v818_v25, %v822_v27 }
 0x3ff   :  { %1654 = vmatpush1.bf16.msra.mxu0 %v2636_v45  ;;  %1695 = vmatpush1.bf16.msra.mxu1 %v2638_v46  ;;  %v2662_v45 = vcombine.low %v763_v34, %v767_v35  ;;  %v2669_v46 = vcombine.high %v770_v40, %v774_v41  ;;  %v826_v34 = vld [vmem:[%s4180_s4 + $0x2d0] sm:$0xff] }
 0x400   :  { %1685 = vmatprep.mubr.bf16.mxu0 %v928_v19  ;;  %1726 = vmatprep.mubr.bf16.mxu1 %v928_v19  ;;  %v815_v19 = vld [vmem:[%s4180_s4 + $0x278] sm:$0xff]  ;;  %v830_v35 = vld [vmem:[%s4180_s4 + $0x2f0] sm:$0xff] }
 0x401   :  { %1655 = vmatprep.subr.bf16.mxu0 %v2645_v22  ;;  %1696 = vmatprep.subr.bf16.mxu1 %v2647_v23  ;;  %v2702_v22 = vcombine.low %v803_v9, %v807_v10  ;;  %v2709_v23 = vcombine.high %v810_v16, %v814_v17  ;;  %v2711_v24 = vcombine.high %v811_v18, %v815_v19 }
 0x402   :  { %v2725_v40 = vcombine.high %v826_v34, %v830_v35  ;;  %v2756_v9 = vcombine.low %v858_v2, %v862_v3 }
 0x403   :  { %1656 = vmatpush1.bf16.msra.mxu0 %v2644_v26  ;;  %1697 = vmatpush1.bf16.msra.mxu1 %v2646_v28  ;;  %v819_v26 = vld [vmem:[%s4180_s4 + $0x298] sm:$0xff] }
 0x404   :  { %1657 = vmatprep.subr.bf16.mxu0 %v2653_v29  ;;  %1698 = vmatprep.subr.bf16.mxu1 %v2655_v30  ;;  %v823_v28 = vld [vmem:[%s4180_s4 + $0x2b8] sm:$0xff]  ;;  %v2708_v29 = vcombine.low %v810_v16, %v814_v17  ;;  %v2710_v30 = vcombine.low %v811_v18, %v815_v19  ;;  %v3082_v16 = vld [vmem:[%s4182_s6 + $0x48] sm:$0xff]  }
 0x405   :  { %v2719_v33 = vcombine.high %v819_v26, %v823_v28  ;;  %v3083_v17 = vld [vmem:[%s4182_s6 + $0xc8] sm:$0xff]  }
 0x406   :  { %v3084_v18 = vld [vmem:[%s4182_s6 + $0x8] sm:$0xff]  }
 0x407   :  { %1658 = vmatpush1.bf16.msra.mxu0 %v2652_v36  ;;  %1699 = vmatpush1.bf16.msra.mxu1 %v2654_v37  ;;  %v827_v36 = vld [vmem:[%s4180_s4 + $0x2d8] sm:$0xff]  ;;  %v3085_v19 = vld [vmem:[%s4182_s6 + $0x88] sm:$0xff]  }
 0x408   :  { %1659 = vmatprep.subr.bf16.mxu0 %v2661_v38  ;;  %1700 = vmatprep.subr.bf16.mxu1 %v2663_v39  ;;  %v831_v37 = vld [vmem:[%s4180_s4 + $0x2f8] sm:$0xff]  ;;  %v2716_v38 = vcombine.low %v818_v25, %v822_v27  ;;  %v2718_v39 = vcombine.low %v819_v26, %v823_v28  ;;  %v3094_v28 = vld [vmem:[%s4182_s6 + $0x60] sm:$0xff]  }
 0x409   :  { %v2727_v41 = vcombine.high %v827_v36, %v831_v37  ;;  %v3091_v25 = vld [vmem:[%s4182_s6 + $0xd8] sm:$0xff]  }
 0x40a   :  { %v3092_v27 = vld [vmem:[%s4182_s6 + $0x18] sm:$0xff]  }
 0x40b   :  { %1660 = vmatpush1.bf16.msra.mxu0 %v2660_v44  ;;  %1701 = vmatpush1.bf16.msra.mxu1 %v2662_v45  ;;  %v835_v44 = vld [vmem:[%s4180_s4 + $0x318] sm:$0xff] }
 0x40c   :  { %1661 = vmatprep.subr.bf16.mxu0 %v2669_v46  ;;  %1702 = vmatprep.subr.bf16.mxu1 %v2671_v47  ;;  %v839_v45 = vld [vmem:[%s4180_s4 + $0x338] sm:$0xff]  ;;  %v2724_v46 = vcombine.low %v826_v34, %v830_v35  ;;  %v2726_v47 = vcombine.low %v827_v36, %v831_v37  ;;  %v3099_v34 = vld [vmem:[%s4182_s6 + $0xe8] sm:$0xff]   ;;  %v3102_v37 = vld [vmem:[%s4182_s6 + $0x70] sm:$0xff]  }
 0x40d   :  { %v2735_v49 = vcombine.high %v835_v44, %v839_v45  ;;  %v3093_v26 = vld [vmem:[%s4182_s6 + $0x98] sm:$0xff]   ;;  %v3100_v35 = vld [vmem:[%s4182_s6 + $0x28] sm:$0xff]  }
 0x40e   :  { %v3101_v36 = vld [vmem:[%s4182_s6 + $0xa8] sm:$0xff]  }
 0x40f   :  { %1662 = vmatpush1.bf16.msra.mxu0 %v2668_v52  ;;  %1703 = vmatpush1.bf16.msra.mxu1 %v2670_v53  ;;  %v843_v52 = vld [vmem:[%s4180_s4 + $0x358] sm:$0xff] }
 0x410   :  { %1663 = vmatprep.subr.bf16.mxu0 %v2677_v54  ;;  %1704 = vmatprep.subr.bf16.mxu1 %v2679_v55  ;;  %v847_v53 = vld [vmem:[%s4180_s4 + $0x378] sm:$0xff]  ;;  %v2732_v54 = vcombine.low %v834_v42, %v838_v43  ;;  %v2734_v55 = vcombine.low %v835_v44, %v839_v45  ;;  %v3110_v45 = vld [vmem:[%s4182_s6 + $0x140] sm:$0xff]  }
 0x411   :  { %v2743_v57 = vcombine.high %v843_v52, %v847_v53  ;;  %v3107_v42 = vld [vmem:[%s4182_s6 + $0xf8] sm:$0xff]  }
 0x412   :  { %v3108_v43 = vld [vmem:[%s4182_s6 + $0x38] sm:$0xff]  }
 0x413   :  { %1664 = vmatpush1.bf16.msra.mxu0 %v2676_v60  ;;  %1705 = vmatpush1.bf16.msra.mxu1 %v2678_v61  ;;  %v851_v60 = vld [vmem:[%s4180_s4 + $0x398] sm:$0xff] }
 0x414   :  { %1665 = vmatprep.subr.bf16.mxu0 %v2685_v62  ;;  %1706 = vmatprep.subr.bf16.mxu1 %v2687_v63  ;;  %v855_v61 = vld [vmem:[%s4180_s4 + $0x3b8] sm:$0xff]  ;;  %v2740_v62 = vcombine.low %v842_v50, %v846_v51  ;;  %v2742_v63 = vcombine.low %v843_v52, %v847_v53  ;;  %v872_v50 = vsub.s32 1, %v3458_v13  ;;  %v880_v51 = vsub.s32 3, %v3458_v13 }
 0x415   :  { %v2751_v1 = vcombine.high %v851_v60, %v855_v61  ;;  %v3109_v44 = vld [vmem:[%s4182_s6 + $0xb8] sm:$0xff]  }
 0x417   :  { %1666 = vmatpush1.bf16.msra.mxu0 %v2684_v4  ;;  %1707 = vmatpush1.bf16.msra.mxu1 %v2686_v5  ;;  %v859_v4 = vld [vmem:[%s4180_s4 + $0x3d8] sm:$0xff] }
 0x418   :  { %1667 = vmatprep.subr.bf16.mxu0 %v2693_v6  ;;  %1708 = vmatprep.subr.bf16.mxu1 %v2695_v7  ;;  %v863_v5 = vld [vmem:[%s4180_s4 + $0x3f8] sm:$0xff]  ;;  %v2748_v6 = vcombine.low %v850_v58, %v854_v59  ;;  %v2750_v7 = vcombine.low %v851_v60, %v855_v61 }
 0x419   :  { %v2759_v8 = vcombine.high %v859_v4, %v863_v5  ;;  %v2758_v10 = vcombine.low %v859_v4, %v863_v5 }
 0x41b   :  { %1668 = vmatpush1.bf16.msra.mxu0 %v2692_v11  ;;  %1709 = vmatpush1.bf16.msra.mxu1 %v2694_v12  ;;  %v3078_v11 = vld [vmem:[%s4182_s6 + $0x40] sm:$0xff]  }
 0x41c   :  { %1669 = vmatprep.subr.bf16.mxu0 %v2701_v14  ;;  %1710 = vmatprep.subr.bf16.mxu1 %v2703_v15  ;;  %v3079_v12 = vld [vmem:[%s4182_s6 + $0xc0] sm:$0xff]  }
 0x41d   :  { %v3080_v14 = vld [vmem:[%s4182_s6] sm:$0xff]  }
 0x41e   :  { %v3081_v15 = vld [vmem:[%s4182_s6 + $0x80] sm:$0xff]  }
 0x41f   :  { %1670 = vmatpush1.bf16.msra.mxu0 %v2700_v21  ;;  %1711 = vmatpush1.bf16.msra.mxu1 %v2702_v22  ;;  %v3086_v21 = vld [vmem:[%s4182_s6 + $0x50] sm:$0xff]  }
 0x420   :  { %1671 = vmatprep.subr.bf16.mxu0 %v2709_v23  ;;  %1712 = vmatprep.subr.bf16.mxu1 %v2711_v24  ;;  %v3088_v22 = vld [vmem:[%s4182_s6 + $0x10] sm:$0xff]   ;;  %v3090_v24 = vld [vmem:[%s4182_s6 + $0x58] sm:$0xff]  }
 0x421   :  { %v3089_v23 = vld [vmem:[%s4182_s6 + $0x90] sm:$0xff]  }
 0x423   :  { %1672 = vmatpush1.bf16.msra.mxu0 %v2708_v29  ;;  %1713 = vmatpush1.bf16.msra.mxu1 %v2710_v30  ;;  %v3095_v29 = vld [vmem:[%s4182_s6 + $0xe0] sm:$0xff]  }
 0x424   :  { %1673 = vmatprep.subr.bf16.mxu0 %v2717_v31  ;;  %1714 = vmatprep.subr.bf16.mxu1 %v2719_v33  ;;  %v3096_v30 = vld [vmem:[%s4182_s6 + $0x20] sm:$0xff]   ;;  %v3098_v33 = vld [vmem:[%s4182_s6 + $0x68] sm:$0xff]  }
 0x425   :  { %v3097_v31 = vld [vmem:[%s4182_s6 + $0xa0] sm:$0xff]  }
 0x427   :  { %1674 = vmatpush1.bf16.msra.mxu0 %v2716_v38  ;;  %1715 = vmatpush1.bf16.msra.mxu1 %v2718_v39  ;;  %v3103_v38 = vld [vmem:[%s4182_s6 + $0xf0] sm:$0xff]  }
 0x428   :  { %1675 = vmatprep.subr.bf16.mxu0 %v2725_v40  ;;  %1716 = vmatprep.subr.bf16.mxu1 %v2727_v41  ;;  %v3104_v39 = vld [vmem:[%s4182_s6 + $0x30] sm:$0xff]   ;;  %v3106_v41 = vld [vmem:[%s4182_s6 + $0x78] sm:$0xff]  }
 0x429   :  { %v3105_v40 = vld [vmem:[%s4182_s6 + $0xb0] sm:$0xff]  }
 0x42b   :  { %1676 = vmatpush1.bf16.msra.mxu0 %v2724_v46  ;;  %1717 = vmatpush1.bf16.msra.mxu1 %v2726_v47  ;;  %v3111_v46 = vld [vmem:[%s4182_s6 + $0x1c0] sm:$0xff]   ;;  %v868_v47 = vsub.s32 0, %v3458_v13 }
 0x42c   :  { %1677 = vmatprep.subr.bf16.mxu0 %v2733_v48  ;;  %1718 = vmatprep.subr.bf16.mxu1 %v2735_v49  ;;  %v876_v48 = vsub.s32 2, %v3458_v13  ;;  %v4028_v49 = vld [vmem:[%s4181_s5] sm:$0xff]  ;;  %s2551_s5 = sshll.u32 %s3187_s20, 4  ;;  %s2552_s5 = int_to_ptr.vmem [resolvable:$true] %s2551_s5 }
 0x42d   :  { %v869_v52 = vrot.slane %v4028_v49, %v868_v47  ;;  %s3152_s21 = scalar_lea.vmem %s2552_s5, 32  ;;  %p3157_p1 = scmp.lt.s32.totalorder %s2552_s5, %s2552_s5 }
 0x42e   :  { %v877_v53 = vrot.slane %v4028_v49, %v876_v48  ;;  %p3153_p0 = scmp.ne.s32.totalorder %s2552_s5, %s3152_s21  ;;  %p3158_p2 = scmp.lt.s32.totalorder %s3152_s21, %s3152_s21 }
 0x42f   :  { %1678 = vmatpush1.bf16.msra.mxu0 %v2732_v54  ;;  %1719 = vmatpush1.bf16.msra.mxu1 %v2734_v55  ;;  %v873_v54 = vrot.slane %v4028_v49, %v872_v50  ;;  %v881_v55 = vrot.slane %v4028_v49, %v880_v51 }
 0x430   :  { %1679 = vmatprep.subr.bf16.mxu0 %v2741_v56  ;;  %1720 = vmatprep.subr.bf16.mxu1 %v2743_v57  ;;  %p3159_p3 = por %p3158_p2, %p3157_p1 }
 0x432   :  { %p3160_p4 = pnand %p3159_p3, %p3153_p0 }
 0x433   :  { %1680 = vmatpush1.bf16.msra.mxu0 %v2740_v62  ;;  %1721 = vmatpush1.bf16.msra.mxu1 %v2742_v63 }
 0x434   :  { %1681 = vmatprep.subr.bf16.mxu0 %v2749_v0  ;;  %1722 = vmatprep.subr.bf16.mxu1 %v2751_v1 }
 0x437   :  { %1682 = vmatpush1.bf16.msra.mxu0 %v2748_v6  ;;  %1723 = vmatpush1.bf16.msra.mxu1 %v2750_v7 }
 0x438   :  { %1683 = vmatprep.subr.bf16.mxu0 %v2757_v32  ;;  %1724 = vmatprep.subr.bf16.mxu1 %v2759_v8 }
 0x43b   :  { %1684 = vmatpush1.bf16.msra.mxu0 %v2756_v9  ;;  %1725 = vmatpush1.bf16.msra.mxu1 %v2758_v10  ;;  %v3112_v9 = vld [vmem:[%s4182_s6 + $0x100] sm:$0xff]  }
 0x43c   :  { %2834 = vmatprep.subr.bf16.mxu0 %v3078_v11  ;;  %2856 = vmatprep.subr.bf16.mxu1 %v3079_v12  ;;  %v3113_v10 = vld [vmem:[%s4182_s6 + $0x180] sm:$0xff]  }
 0x43e   :  { %1686 = vmatmul.mubr.bf16.vlgmr.msra.gmra.mrb[8].mxu0 %v3741_v20  ;;  %1727 = vmatmul.mubr.bf16.vlgmr.msra.gmra.mrb[8].mxu1 %v3741_v20  ;;  %v3087_v20 = vld [vmem:[%s4182_s6 + $0xd0] sm:$0xff]  }
 0x43f   :  { %2835 = vmatpush3.bf16.msra.mxu0 %v3080_v14  ;;  %2857 = vmatpush3.bf16.msra.mxu1 %v3081_v15  ;;  %v3114_v14 = vld [vmem:[%s4182_s6 + $0x148] sm:$0xff]  }
 0x440   :  { %2836 = vmatprep.subr.bf16.mxu0 %v3082_v16  ;;  %2858 = vmatprep.subr.bf16.mxu1 %v3083_v17  ;;  %v3115_v15 = vld [vmem:[%s4182_s6 + $0x1c8] sm:$0xff]  }
 0x441   :  { %v3116_v16 = vld [vmem:[%s4182_s6 + $0x108] sm:$0xff]  }
 0x442   :  { %v3117_v17 = vld [vmem:[%s4182_s6 + $0x188] sm:$0xff]  }
 0x443   :  { %2837 = vmatpush3.bf16.msra.mxu0 %v3084_v18  ;;  %2859 = vmatpush3.bf16.msra.mxu1 %v3085_v19  ;;  %v3118_v18 = vld [vmem:[%s4182_s6 + $0x150] sm:$0xff]  }
 0x444   :  { %2838 = vmatprep.subr.bf16.mxu0 %v3086_v21  ;;  %2860 = vmatprep.subr.bf16.mxu1 %v3087_v20  ;;  %v3119_v19 = vld [vmem:[%s4182_s6 + $0x1d0] sm:$0xff]  }
 0x445   :  { %v3120_v21 = vld [vmem:[%s4182_s6 + $0x110] sm:$0xff]  }
 0x446   :  { %v3121_v20 = vld [vmem:[%s4182_s6 + $0x190] sm:$0xff]  }
 0x447   :  { %2839 = vmatpush3.bf16.msra.mxu0 %v3088_v22  ;;  %2861 = vmatpush3.bf16.msra.mxu1 %v3089_v23  ;;  %v3122_v22 = vld [vmem:[%s4182_s6 + $0x158] sm:$0xff]  }
 0x448   :  { %2840 = vmatprep.subr.bf16.mxu0 %v3090_v24  ;;  %2862 = vmatprep.subr.bf16.mxu1 %v3091_v25  ;;  %v3123_v23 = vld [vmem:[%s4182_s6 + $0x1d8] sm:$0xff]  }
 0x449   :  { %v3124_v24 = vld [vmem:[%s4182_s6 + $0x118] sm:$0xff]  }
 0x44a   :  { %v3125_v25 = vld [vmem:[%s4182_s6 + $0x198] sm:$0xff]  }
 0x44b   :  { %2841 = vmatpush3.bf16.msra.mxu0 %v3092_v27  ;;  %2863 = vmatpush3.bf16.msra.mxu1 %v3093_v26  ;;  %v3126_v27 = vld [vmem:[%s4182_s6 + $0x160] sm:$0xff]  }
 0x44c   :  { %2842 = vmatprep.subr.bf16.mxu0 %v3094_v28  ;;  %2864 = vmatprep.subr.bf16.mxu1 %v3095_v29  ;;  %v3127_v26 = vld [vmem:[%s4182_s6 + $0x1e0] sm:$0xff]  }
 0x44d   :  { %v3128_v28 = vld [vmem:[%s4182_s6 + $0x120] sm:$0xff]  }
 0x44e   :  { %v3129_v29 = vld [vmem:[%s4182_s6 + $0x1a0] sm:$0xff]  }
 0x44f   :  { %2843 = vmatpush3.bf16.msra.mxu0 %v3096_v30  ;;  %2865 = vmatpush3.bf16.msra.mxu1 %v3097_v31  ;;  %v3130_v30 = vld [vmem:[%s4182_s6 + $0x168] sm:$0xff]  }
 0x450   :  { %2844 = vmatprep.subr.bf16.mxu0 %v3098_v33  ;;  %2866 = vmatprep.subr.bf16.mxu1 %v3099_v34  ;;  %v3131_v31 = vld [vmem:[%s4182_s6 + $0x1e8] sm:$0xff]  }
 0x451   :  { %v3132_v33 = vld [vmem:[%s4182_s6 + $0x128] sm:$0xff]  }
 0x452   :  { %v3133_v34 = vld [vmem:[%s4182_s6 + $0x1a8] sm:$0xff]  }
 0x453   :  { %2845 = vmatpush3.bf16.msra.mxu0 %v3100_v35  ;;  %2867 = vmatpush3.bf16.msra.mxu1 %v3101_v36  ;;  %v3134_v35 = vld [vmem:[%s4182_s6 + $0x170] sm:$0xff]  }
 0x454   :  { %2846 = vmatprep.subr.bf16.mxu0 %v3102_v37  ;;  %2868 = vmatprep.subr.bf16.mxu1 %v3103_v38  ;;  %v3135_v36 = vld [vmem:[%s4182_s6 + $0x1f0] sm:$0xff]  }
 0x455   :  { %v3136_v37 = vld [vmem:[%s4182_s6 + $0x130] sm:$0xff]  }
 0x456   :  { %v3137_v38 = vld [vmem:[%s4182_s6 + $0x1b0] sm:$0xff]  }
 0x457   :  { %2847 = vmatpush3.bf16.msra.mxu0 %v3104_v39  ;;  %2869 = vmatpush3.bf16.msra.mxu1 %v3105_v40  ;;  %v3138_v39 = vld [vmem:[%s4182_s6 + $0x178] sm:$0xff]  }
 0x458   :  { %2848 = vmatprep.subr.bf16.mxu0 %v3106_v41  ;;  %2870 = vmatprep.subr.bf16.mxu1 %v3107_v42  ;;  %v3139_v40 = vld [vmem:[%s4182_s6 + $0x1f8] sm:$0xff]  }
 0x459   :  { %v3140_v41 = vld [vmem:[%s4182_s6 + $0x138] sm:$0xff]  }
 0x45a   :  { %v3141_v42 = vld [vmem:[%s4182_s6 + $0x1b8] sm:$0xff]  }
 0x45b   :  { %2849 = vmatpush3.bf16.msra.mxu0 %v3108_v43  ;;  %2871 = vmatpush3.bf16.msra.mxu1 %v3109_v44  ;;  %v884_v43 = vsub.s32 4, %v3458_v13  ;;  %v892_v44 = vsub.s32 6, %v3458_v13 }
 0x45c   :  { %2878 = vmatprep.subr.bf16.mxu0 %v3110_v45  ;;  %2900 = vmatprep.subr.bf16.mxu1 %v3111_v46  ;;  %v888_v45 = vsub.s32 5, %v3458_v13  ;;  %v896_v46 = vsub.s32 7, %v3458_v13 }
 0x45d   :  { %v885_v47 = vrot.slane %v4028_v49, %v884_v43  ;;  %v893_v48 = vrot.slane %v4028_v49, %v892_v44  ;;  %v2825_v43 = vld [vmem:[%s4185_s9] ss:$0 sm:$0xff] }
 0x45e   :  { %v889_v50 = vrot.slane %v4028_v49, %v888_v45  ;;  %v897_v51 = vrot.slane %v4028_v49, %v896_v46 }
 0x4d1   :  { %v1605_v56 = vpop.f32.mrb[4].mxu0  ;;  %v1646_v57 = vpop.f32.mrb[4].mxu1 }
 0x4d2   :  { %v1606_v58 = vadd.f32 %v1605_v56, %v869_v52  ;;  %v1647_v59 = vadd.f32 %v1646_v57, %v877_v53  ;;  %v1607_v60 = vpop.f32.mrb[5].mxu0  ;;  %v1648_v61 = vpop.f32.mrb[5].mxu1 }
 0x4d3   :  { %v1608_v62 = vadd.f32 %v1607_v60, %v873_v54  ;;  %v1649_v63 = vadd.f32 %v1648_v61, %v881_v55  ;;  %v1609_v0 = vpop.f32.mrb[6].mxu0  ;;  %v1650_v1 = vpop.f32.mrb[6].mxu1 }
 0x4d4   :  { %v1735_v2 = vmax.f32 %v1606_v58, 0.0  ;;  %v1737_v3 = vmax.f32 %v1647_v59, 0.0  ;;  %v1610_v4 = vpop.f32.mrb[7].mxu0  ;;  %v1651_v5 = vpop.f32.mrb[7].mxu1 }
 0x4d5   :  { %v1736_v6 = vmax.f32 %v1608_v62, 0.0  ;;  %v1738_v7 = vmax.f32 %v1649_v63, 0.0 }
 0x4d6   :  { %v1743_v11 = vpack.c.bf16 %v1735_v2, %v1735_v2  ;;  %v1745_v12 = vpack.c.bf16 %v1737_v3, %v1737_v3 }
 0x4d7   :  { %v1744_v32 = vpack.c.bf16 %v1736_v6, %v1736_v6  ;;  %v1746_v8 = vpack.c.bf16 %v1738_v7, %v1738_v7  ;;  %v3142_v6 = vld [vmem:[%s4184_s8] sm:$0xff]   ;;  %v3185_v7 = vmov 0.0  }
 0x4d9   :  { %2302 = vmatprep.mubr.bf16.mxu0 %v1744_v32  ;;  %2342 = vmatprep.mubr.bf16.mxu1 %v1746_v8  ;;  %v3143_v32 = vld [vmem:[%s4184_s8 + $0x8] sm:$0xff]   ;;  %v3144_v8 = vld [vmem:[%s4184_s8 + $0x10] sm:$0xff]  }
 0x4da   :  { %2303 = vmatmul.mubr.bf16.vlgmr.msra.gmra.mrb[12].mxu0 %v1743_v11  ;;  %2343 = vmatmul.mubr.bf16.vlgmr.msra.gmra.mrb[12].mxu1 %v1745_v12  ;;  %v3147_v11 = vld [vmem:[%s4184_s8 + $0x28] sm:$0xff]   ;;  %v3148_v12 = vld [vmem:[%s4184_s8 + $0x30] sm:$0xff]  }
 0x4db   :  { %2879 = vmatpush3.bf16.msra.mxu0 %v3112_v9  ;;  %2901 = vmatpush3.bf16.msra.mxu1 %v3113_v10  ;;  %v3145_v9 = vld [vmem:[%s4184_s8 + $0x18] sm:$0xff]   ;;  %v3146_v10 = vld [vmem:[%s4184_s8 + $0x20] sm:$0xff]  }
 0x4dc   :  { %2880 = vmatprep.subr.bf16.mxu0 %v3114_v14  ;;  %2902 = vmatprep.subr.bf16.mxu1 %v3115_v15  ;;  %v3149_v14 = vld [vmem:[%s4184_s8 + $0x38] sm:$0xff]  }
 0x4df   :  { %2881 = vmatpush3.bf16.msra.mxu0 %v3116_v16  ;;  %2903 = vmatpush3.bf16.msra.mxu1 %v3117_v17  ;;  %v2760_v17 = vld [vmem:[%s4183_s7] ss:$0 sm:$0xff] }
 0x4e0   :  { %2882 = vmatprep.subr.bf16.mxu0 %v3118_v18  ;;  %2904 = vmatprep.subr.bf16.mxu1 %v3119_v19 }
 0x4e3   :  { %2883 = vmatpush3.bf16.msra.mxu0 %v3120_v21  ;;  %2905 = vmatpush3.bf16.msra.mxu1 %v3121_v20 }
 0x4e4   :  { %2884 = vmatprep.subr.bf16.mxu0 %v3122_v22  ;;  %2906 = vmatprep.subr.bf16.mxu1 %v3123_v23 }
 0x4e7   :  { %2885 = vmatpush3.bf16.msra.mxu0 %v3124_v24  ;;  %2907 = vmatpush3.bf16.msra.mxu1 %v3125_v25 }
 0x4e8   :  { %2886 = vmatprep.subr.bf16.mxu0 %v3126_v27  ;;  %2908 = vmatprep.subr.bf16.mxu1 %v3127_v26 }
 0x4eb   :  { %2887 = vmatpush3.bf16.msra.mxu0 %v3128_v28  ;;  %2909 = vmatpush3.bf16.msra.mxu1 %v3129_v29 }
 0x4ec   :  { %2888 = vmatprep.subr.bf16.mxu0 %v3130_v30  ;;  %2910 = vmatprep.subr.bf16.mxu1 %v3131_v31 }
 0x4ef   :  { %2889 = vmatpush3.bf16.msra.mxu0 %v3132_v33  ;;  %2911 = vmatpush3.bf16.msra.mxu1 %v3133_v34 }
 0x4f0   :  { %2890 = vmatprep.subr.bf16.mxu0 %v3134_v35  ;;  %2912 = vmatprep.subr.bf16.mxu1 %v3135_v36 }
 0x4f3   :  { %2891 = vmatpush3.bf16.msra.mxu0 %v3136_v37  ;;  %2913 = vmatpush3.bf16.msra.mxu1 %v3137_v38 }
 0x4f4   :  { %2892 = vmatprep.subr.bf16.mxu0 %v3138_v39  ;;  %2914 = vmatprep.subr.bf16.mxu1 %v3139_v40 }
 0x4f7   :  { %2893 = vmatpush3.bf16.msra.mxu0 %v3140_v41  ;;  %2915 = vmatpush3.bf16.msra.mxu1 %v3141_v42 }
 0x4f8   :  { %2931 = vmatprep.subr.bf16.mxu0 %v3185_v7 }
 0x511   :  { %v1687_v52 = vpop.f32.mrb[8].mxu0  ;;  %v1728_v53 = vpop.f32.mrb[8].mxu1 }
 0x512   :  { %v1688_v54 = vadd.f32 %v1687_v52, %v885_v47  ;;  %v1729_v55 = vadd.f32 %v1728_v53, %v893_v48  ;;  %v1689_v56 = vpop.f32.mrb[9].mxu0  ;;  %v1730_v57 = vpop.f32.mrb[9].mxu1 }
 0x513   :  { %v1690_v58 = vadd.f32 %v1689_v56, %v889_v50  ;;  %v1731_v59 = vadd.f32 %v1730_v57, %v897_v51  ;;  %v1691_v60 = vpop.f32.mrb[10].mxu0  ;;  %v1732_v61 = vpop.f32.mrb[10].mxu1 }
 0x514   :  { %v1739_v62 = vmax.f32 %v1688_v54, 0.0  ;;  %v1741_v13 = vmax.f32 %v1729_v55, 0.0  ;;  %v1692_v63 = vpop.f32.mrb[11].mxu0  ;;  %v1733_v0 = vpop.f32.mrb[11].mxu1 }
 0x515   :  { %v1740_v1 = vmax.f32 %v1690_v58, 0.0  ;;  %v1742_v2 = vmax.f32 %v1731_v59, 0.0 }
 0x516   :  { %v1747_v5 = vpack.c.bf16 %v1739_v62, %v1739_v62  ;;  %v1749_v49 = vpack.c.bf16 %v1741_v13, %v1741_v13 }
 0x517   :  { %v1748_v3 = vpack.c.bf16 %v1740_v1, %v1740_v1  ;;  %v1750_v4 = vpack.c.bf16 %v1742_v2, %v1742_v2 }
 0x519   :  { %2382 = vmatprep.mubr.bf16.mxu0 %v1748_v3  ;;  %2422 = vmatprep.mubr.bf16.mxu1 %v1750_v4 }
 0x51a   :  { %2383 = vmatmul.mubr.bf16.vlgmr.msra.gmra.mrb[16].mxu0 %v1747_v5  ;;  %2423 = vmatmul.mubr.bf16.vlgmr.msra.gmra.mrb[16].mxu1 %v1749_v49 }
 0x51b   :  { %2932 = vmatpush3.bf16.msra.mxu0 %v3142_v6  ;;  %2947 = vmatprep.mubr.msk.bf16.mxu0 %vm3186_vm10, %v3185_v7 }
 0x51c   :  { %2933 = vmatprep.subr.bf16.mxu0 %v3185_v7 }
 0x51f   :  { %2934 = vmatpush3.bf16.msra.mxu0 %v3143_v32 }
 0x520   :  { %2935 = vmatprep.subr.bf16.mxu0 %v3185_v7 }
 0x523   :  { %2936 = vmatpush3.bf16.msra.mxu0 %v3144_v8 }
 0x524   :  { %2937 = vmatprep.subr.bf16.mxu0 %v3185_v7 }
 0x527   :  { %2938 = vmatpush3.bf16.msra.mxu0 %v3145_v9 }
 0x528   :  { %2939 = vmatprep.subr.bf16.mxu0 %v3185_v7 }
 0x52b   :  { %2940 = vmatpush3.bf16.msra.mxu0 %v3146_v10 }
 0x52c   :  { %2941 = vmatprep.subr.bf16.mxu0 %v3185_v7 }
 0x52f   :  { %2942 = vmatpush3.bf16.msra.mxu0 %v3147_v11 }
 0x530   :  { %2943 = vmatprep.subr.bf16.mxu0 %v3185_v7 }
 0x533   :  { %2944 = vmatpush3.bf16.msra.mxu0 %v3148_v12 }
 0x534   :  { %2945 = vmatprep.subr.bf16.mxu0 %v3185_v7 }
 0x537   :  { %2946 = vmatpush3.bf16.msra.mxu0 %v3149_v14 }
 0x5ad   :  { %v2850_v15 = vpop.f32.mrb[12].mxu0  ;;  %v2872_v16 = vpop.f32.mrb[12].mxu1 }
 0x5ae   :  { %v2851_v18 = vpop.f32.mrb[13].mxu0  ;;  %v2873_v19 = vpop.f32.mrb[13].mxu1 }
 0x5af   :  { %v2852_v21 = vadd.f32 %v2851_v18, %v2850_v15  ;;  %v2874_v20 = vadd.f32 %v2873_v19, %v2872_v16  ;;  %v2853_v22 = vpop.f32.mrb[14].mxu0  ;;  %v2875_v23 = vpop.f32.mrb[14].mxu1 }
 0x5b0   :  { %v2854_v24 = vpop.f32.mrb[15].mxu0  ;;  %v2876_v25 = vpop.f32.mrb[15].mxu1 }
 0x5b1   :  { %v2305_v27 = vadd.f32 %v2852_v21, %v2760_v17 }
 0x5b3   :  { %v2345_v26 = vadd.f32 %v2874_v20, %v2305_v27 }
 0x5ed   :  { %v2894_v28 = vpop.f32.mrb[16].mxu0  ;;  %v2916_v29 = vpop.f32.mrb[16].mxu1 }
 0x5ee   :  { %v2895_v30 = vpop.f32.mrb[17].mxu0  ;;  %v2917_v31 = vpop.f32.mrb[17].mxu1 }
 0x5ef   :  { %v2896_v33 = vadd.f32 %v2895_v30, %v2894_v28  ;;  %v2918_v34 = vadd.f32 %v2917_v31, %v2916_v29  ;;  %v2897_v35 = vpop.f32.mrb[18].mxu0  ;;  %v2919_v36 = vpop.f32.mrb[18].mxu1 }
 0x5f0   :  { %v2898_v37 = vpop.f32.mrb[19].mxu0  ;;  %v2920_v38 = vpop.f32.mrb[19].mxu1 }
 0x5f1   :  { %v2385_v39 = vadd.f32 %v2896_v33, %v2345_v26 }
 0x5f3   :  { %v2425_v40 = vadd.f32 %v2918_v34, %v2385_v39 }
 0x5f5   :  { %v2430_v41 = vmax.f32 %v2425_v40, 0.0 }
 0x5f7   :  { %v2431_v42 = vpack.c.bf16 %v2430_v41, %v2430_v41 }
 0x5f9   :  { %2948 = vmatmul.mubr.bf16.vlgmr.msra.gmra.mrb[20].mxu0 %v2431_v42 }
 0x6cc   :  { %v2537_v44 = vpop.f32.mrb[20].mxu0 }
 0x6cd   :  { %v2538_v45 = vadd.f32 %v2825_v43, %v2537_v44  ;;  %v2949_v46 = vpop.f32.mrb[21].mxu0 }
 0x6ce   :  { %v2540_v47 = vpop.f32.mrb[22].mxu0 }
 0x6cf   :  { %v2950_v48 = vpop.f32.mrb[23].mxu0  ;;  %2544 = vst.msk [vmem:[#allocation3] sm:$0x3] %vm2543_vm11, %v2538_v45 }
 0x6d0   :  { %3163 = shalt.err (!%p3160_p4)
}
 0x6d1   :  { %s3164_s9 = scalar_lea.hbm %s4186_s10, 32 }
 0x6d2   :  { %p3165_p5 = scmp.ne.s32.totalorder %s4186_s10, %s3164_s9  ;;  %p3168_p6 = scmp.lt.u32.totalorder %s3164_s9, %s4186_s10 }
 0x6d4   :  { %p3170_p7 = pnand %p3168_p6, %p3165_p5 }
 0x6d6   :  { %3173 = shalt.err (!%p3170_p7)
}
 0x6d7   :  { %2554 = dma.vmem_to_hbm [thread:$0]  %s2552_s5, 32, %s4186_s10, [#allocation4]  }
 0x6d8   :  { %3174 = dma.done.wait [#allocation4], 32  }
 0x6d9   :  { %3175 = vsyncadd [#allocation4], 4294967264 }
 0x6da   :  { %2558 = vsyncpa [#allocation4], 1 }

</bundles_post_ra>
